<compile_context>
chip_gen: v7x
topology: tpu7x:2x2x1
jax: 0.10.0
libtpu: 0.0.40
codegen_flags: <defaults>
</compile_context>

<pallas_src>
import functools

import jax
import jax.numpy as jnp
from jax import lax
from jax.experimental import pallas as pl
from jax.experimental.pallas import tpu as pltpu

_STATIC_SLAB_UNROLL = 4  # <= this many row slabs -> fully static in-kernel loop


def _conv3x3_kernel(x_ref, w_ref, b_ref, o_ref, *, row_tile):
    # x_ref: (1, H+2, W+2, Cin)  compute_dtype  padded input image (resident block)
    # w_ref: (3, 3, Cin, CT)     compute_dtype  weights for this Cout tile
    # b_ref: (1, CT)             f32            bias slice
    # o_ref: (1, H, W, CT)       f32            output image for this Cout tile
    _, H, W, CT = o_ref.shape
    Cin = x_ref.shape[-1]
    TH = row_tile
    nt_full = H // TH
    rem = H - nt_full * TH

    bias = b_ref[...]  # (1, CT) f32, hoisted once per grid step

    def slab(row0, th):
        # Padded-input rows [row0, row0 + th + 2): a major-axis window of the
        # resident VMEM block (lane/sublane dims untouched -> cheap load).
        xs = x_ref[0, pl.ds(row0, th + 2), :, :]          # (th+2, W+2, Cin)
        acc = None
        for dy in range(3):
            for dx in range(3):
                win = xs[dy:dy + th, dx:dx + W, :].reshape(th * W, Cin)
                part = jnp.dot(win, w_ref[dy, dx, :, :],
                               preferred_element_type=jnp.float32)
                # Chained accumulation so the adds stay on the MXU result path
                # (MRB in-place accumulate on v7x); 9 taps, K = Cin each.
                acc = part if acc is None else acc + part
        acc = acc + bias                                   # (1, CT) broadcast
        o_ref[0, pl.ds(row0, th), :, :] = acc.reshape(th, W, CT).astype(o_ref.dtype)

    if nt_full <= _STATIC_SLAB_UNROLL:
        # Few slabs: fully static offsets (best addressing / LLO visibility).
        for t in range(nt_full):
            slab(t * TH, TH)
    else:
        def body(t, carry):
            slab(pl.multiple_of(t * TH, TH), TH)
            return carry
        lax.fori_loop(0, nt_full, body, 0)

    if rem:
        # Static remainder slab: supports any H without padding or TH | H.
        slab(nt_full * TH, rem)


def _round_up(a, m):
    return ((a + m - 1) // m) * m


def _pick_cout_tile(cout):
    """(tile_width, padded_cout).  <=128: exact width (no padded writeback)."""
    if cout <= 128:
        return cout, cout
    # 256-wide tiles fill the v6e/v7x 256-wide MXU; on v5e 128 would be enough.
    ct = 256 if cout % 256 == 0 else 128
    return ct, _round_up(cout, ct)


def _pick_row_tile(h, w):
    """Rows per in-kernel slab: M = TH*W ~ 2k keeps the f32 accumulator small
    (<= ~2 MiB at CT=256) while amortizing per-matmul overhead."""
    return max(1, min(h, pl.cdiv(2048, w)))


def _vmem_bytes(h, w, cin, ct, th, in_itemsize):
    """Conservative VMEM footprint: lane (128) / sublane padded, double-buffered
    pipeline blocks plus the live in-kernel values (slab window, tap copy, acc)."""
    lane = 128
    sub_in = 8 * (4 // in_itemsize)                 # 16 for bf16, 8 for f32
    in_blk = (h + 2) * _round_up(w + 2, sub_in) * _round_up(cin, lane) * in_itemsize
    w_blk = 9 * _round_up(cin, sub_in) * _round_up(ct, lane) * in_itemsize
    b_blk = 8 * _round_up(ct, lane) * 4
    out_blk = h * _round_up(w, 8) * _round_up(ct, lane) * 4
    slab = (th + 2) * _round_up(w + 2, sub_in) * _round_up(cin, lane) * in_itemsize
    tap = _round_up(th * w, sub_in) * _round_up(cin, lane) * in_itemsize
    acc = _round_up(th * w, 8) * _round_up(ct, lane) * 4
    return 2 * (in_blk + w_blk + b_blk + out_blk) + slab + tap + 2 * acc


@functools.partial(jax.jit, static_argnames=("use_refl", "row_tile", "compute_dtype"))
def conv3x3_pallas(x_nchw, weight_oihw, bias, use_refl=True, row_tile=None,
                   compute_dtype=jnp.bfloat16):
    """Reflection(or zero)-pad by 1 then 3x3 conv, matching Conv3x3.forward.

    x_nchw:      (N, Cin, H, W)    float32
    weight_oihw: (Cout, Cin, 3, 3) float32  (PyTorch OIHW convention)
    bias:        (Cout,)           float32
    returns:     (N, Cout, H, W)   float32
    """
    N, Cin, H, W = x_nchw.shape
    Cout = weight_oihw.shape[0]
    if use_refl and (H < 2 or W < 2):
        raise ValueError("ReflectionPad2d(1) requires H >= 2 and W >= 2")

    CT, Cout_pad = _pick_cout_tile(Cout)
    n_ct = Cout_pad // CT
    TH = min(H, row_tile) if row_tile is not None else _pick_row_tile(H, W)

    # ---------------- layout glue (fused by XLA under this jit) ----------------
    x_nhwc = jnp.transpose(x_nchw, (0, 2, 3, 1)).astype(compute_dtype)  # (N,H,W,Cin)
    pad_mode = "reflect" if use_refl else "constant"
    x_pad = jnp.pad(x_nhwc, ((0, 0), (1, 1), (1, 1), (0, 0)), mode=pad_mode)

    w = jnp.transpose(weight_oihw, (2, 3, 1, 0))             # (3, 3, Cin, Cout)
    b1d = bias
    if Cout_pad != Cout:
        w = jnp.pad(w, ((0, 0), (0, 0), (0, 0), (0, Cout_pad - Cout)))
        b1d = jnp.pad(b1d, (0, Cout_pad - Cout))
    w = w.astype(compute_dtype)
    b2d = b1d.reshape(1, Cout_pad).astype(jnp.float32)

    itemsize = jnp.dtype(compute_dtype).itemsize
    est = _vmem_bytes(H, W, Cin, CT, TH, itemsize)
    # Explicit scoped-VMEM limit from the corrected estimate.  32 MiB floor is
    # safe on every generation; very large images would need an H-tiled grid
    # (and a ~24-32 MiB cap on v7x, which only has 64 MiB physical VMEM).
    vmem_limit = int(min(max(est * 1.25, 32 << 20), 100 << 20))

    kernel = functools.partial(_conv3x3_kernel, row_tile=TH)

    # Grid: images on the slow (parallel) axis, Cout tiles on the fast axis.
    # The input block index depends only on the image -> each image is DMA'd
    # exactly once; the weight/bias block index depends only on the Cout tile
    # -> weights stream once per call whenever Cout fits a single tile.
    out = pl.pallas_call(
        kernel,
        out_shape=jax.ShapeDtypeStruct((N, H, W, Cout_pad), jnp.float32),
        grid_spec=pltpu.PrefetchScalarGridSpec(
            num_scalar_prefetch=0,
            grid=(N, n_ct),
            in_specs=[
                pl.BlockSpec((1, H + 2, W + 2, Cin), lambda b, c: (b, 0, 0, 0)),
                pl.BlockSpec((3, 3, Cin, CT), lambda b, c: (0, 0, 0, c)),
                pl.BlockSpec((1, CT), lambda b, c: (0, c)),
            ],
            out_specs=pl.BlockSpec((1, H, W, CT), lambda b, c: (b, 0, 0, c)),
        ),
        compiler_params=pltpu.CompilerParams(
            dimension_semantics=("parallel", "arbitrary"),
            vmem_limit_bytes=vmem_limit),
    )(x_pad, w, b2d)

    if Cout_pad != Cout:
        out = out[..., :Cout]                                 # drop lane padding
    return jnp.transpose(out, (0, 3, 1, 2))                   # back to NCHW


if __name__ == "__main__":
    key = jax.random.PRNGKey(0)
    k_x, k_w, k_b = jax.random.split(key, 3)

    # Small shapes consistent with the module: N=2, Cin=4, Cout=8, H=W=16.
    N, Cin, Cout, H, W = 2, 4, 8, 16, 16

    x = jax.random.normal(k_x, (N, Cin, H, W), dtype=jnp.float32)
    fan_in = Cin * 3 * 3
    bound = 1.0 / (fan_in ** 0.5)
    weight = jax.random.uniform(k_w, (Cout, Cin, 3, 3), jnp.float32, -bound, bound)
    bias = jax.random.uniform(k_b, (Cout,), jnp.float32, -bound, bound)

    # Reference: reflection pad + VALID 3x3 conv in f32.
    x_pad_ref = jnp.pad(x, ((0, 0), (0, 0), (1, 1), (1, 1)), mode="reflect")
    ref = jax.lax.conv_general_dilated(
        x_pad_ref, weight, window_strides=(1, 1), padding="VALID",
        dimension_numbers=("NCHW", "OIHW", "NCHW")) + bias[None, :, None, None]

    # 1) Default path: single static row slab per image.
    out = jax.block_until_ready(conv3x3_pallas(x, weight, bias))
    assert out.shape == (N, Cout, H, W)
    # bf16 matmul operands (f32 accumulate) -> loosened tolerance vs f32 ref.
    assert jnp.allclose(out, ref, atol=5e-2, rtol=5e-2)

    # 2) Forced small row tile: static multi-slab path + remainder slab (16 = 2*6 + 4).
    out2 = jax.block_until_ready(conv3x3_pallas(x, weight, bias, row_tile=6))
    assert jnp.allclose(out2, ref, atol=5e-2, rtol=5e-2)

    # 3) Even smaller row tile: exercises the in-kernel fori_loop path (16 = 5*3 + 1).
    out3 = jax.block_until_ready(conv3x3_pallas(x, weight, bias, row_tile=3))
    assert jnp.allclose(out3, ref, atol=5e-2, rtol=5e-2)

    print("KERNEL_OK")
</pallas_src>

<mosaic_0001>
module attributes {stable_mosaic.version = 11 : i64} {
  func.func @_conv3x3_kernel(%arg0: i32, %arg1: i32, %arg2: memref<1x18x18x4xbf16, #tpu.memory_space<vmem>>, %arg3: memref<3x3x4x8xbf16, #tpu.memory_space<vmem>>, %arg4: memref<1x8xf32, #tpu.memory_space<vmem>>, %arg5: memref<1x16x16x8xf32, #tpu.memory_space<vmem>>) attributes {dimension_semantics = [#tpu.dimension_semantics<parallel>, #tpu.dimension_semantics<arbitrary>], iteration_bounds = array<i64: 2, 1>, scalar_prefetch = 0 : i64, scratch_operands = 0 : i64, tpu.core_type = #tpu.core_type<tc>, window_params = [{transform_indices = @transform_0, window_bounds = array<i64: 1, 18, 18, 4>}, {transform_indices = @transform_1, window_bounds = array<i64: 3, 3, 4, 8>}, {transform_indices = @transform_2, window_bounds = array<i64: 1, 8>}, {transform_indices = @transform_3, window_bounds = array<i64: 1, 16, 16, 8>}]} {
    %c0 = arith.constant 0 : index
    %c0_0 = arith.constant 0 : index
    %0 = vector.load %arg4[%c0, %c0_0] : memref<1x8xf32, #tpu.memory_space<vmem>>, vector<1x8xf32>
    %c0_1 = arith.constant 0 : index
    %c0_2 = arith.constant 0 : index
    %c0_3 = arith.constant 0 : index
    %c0_4 = arith.constant 0 : index
    %1 = vector.load %arg2[%c0_1, %c0_2, %c0_3, %c0_4] : memref<1x18x18x4xbf16, #tpu.memory_space<vmem>>, vector<1x18x18x4xbf16>
    %2 = vector.shape_cast %1 : vector<1x18x18x4xbf16> to vector<18x18x4xbf16>
    %3 = vector.extract_strided_slice %2 {offsets = [0, 0, 0], sizes = [16, 16, 4], strides = [1, 1, 1]} : vector<18x18x4xbf16> to vector<16x16x4xbf16>
    %4 = vector.shape_cast %3 : vector<16x16x4xbf16> to vector<256x4xbf16>
    %c0_5 = arith.constant 0 : index
    %c0_6 = arith.constant 0 : index
    %c0_7 = arith.constant 0 : index
    %c0_8 = arith.constant 0 : index
    %5 = vector.load %arg3[%c0_5, %c0_6, %c0_7, %c0_8] : memref<3x3x4x8xbf16, #tpu.memory_space<vmem>>, vector<1x1x4x8xbf16>
    %6 = vector.shape_cast %5 : vector<1x1x4x8xbf16> to vector<4x8xbf16>
    %cst = arith.constant dense<0.000000e+00> : vector<256x8xf32>
    %7 = tpu.matmul %4, %6, %cst {dimension_numbers = #tpu.dot_dimension_numbers<[1], [0], [0], [1], [0, 0, 1, 1], [], []>} : vector<256x4xbf16>, vector<4x8xbf16>, vector<256x8xf32> -> vector<256x8xf32>
    %8 = vector.extract_strided_slice %2 {offsets = [0, 1, 0], sizes = [16, 16, 4], strides = [1, 1, 1]} : vector<18x18x4xbf16> to vector<16x16x4xbf16>
    %9 = vector.shape_cast %8 : vector<16x16x4xbf16> to vector<256x4xbf16>
    %c0_9 = arith.constant 0 : index
    %c1 = arith.constant 1 : index
    %c0_10 = arith.constant 0 : index
    %c0_11 = arith.constant 0 : index
    %10 = vector.load %arg3[%c0_9, %c1, %c0_10, %c0_11] : memref<3x3x4x8xbf16, #tpu.memory_space<vmem>>, vector<1x1x4x8xbf16>
    %11 = vector.shape_cast %10 : vector<1x1x4x8xbf16> to vector<4x8xbf16>
    %cst_12 = arith.constant dense<0.000000e+00> : vector<256x8xf32>
    %12 = tpu.matmul %9, %11, %cst_12 {dimension_numbers = #tpu.dot_dimension_numbers<[1], [0], [0], [1], [0, 0, 1, 1], [], []>} : vector<256x4xbf16>, vector<4x8xbf16>, vector<256x8xf32> -> vector<256x8xf32>
    %13 = arith.addf %7, %12 : vector<256x8xf32>
    %14 = vector.extract_strided_slice %2 {offsets = [0, 2, 0], sizes = [16, 16, 4], strides = [1, 1, 1]} : vector<18x18x4xbf16> to vector<16x16x4xbf16>
    %15 = vector.shape_cast %14 : vector<16x16x4xbf16> to vector<256x4xbf16>
    %c0_13 = arith.constant 0 : index
    %c2 = arith.constant 2 : index
    %c0_14 = arith.constant 0 : index
    %c0_15 = arith.constant 0 : index
    %16 = vector.load %arg3[%c0_13, %c2, %c0_14, %c0_15] : memref<3x3x4x8xbf16, #tpu.memory_space<vmem>>, vector<1x1x4x8xbf16>
    %17 = vector.shape_cast %16 : vector<1x1x4x8xbf16> to vector<4x8xbf16>
    %cst_16 = arith.constant dense<0.000000e+00> : vector<256x8xf32>
    %18 = tpu.matmul %15, %17, %cst_16 {dimension_numbers = #tpu.dot_dimension_numbers<[1], [0], [0], [1], [0, 0, 1, 1], [], []>} : vector<256x4xbf16>, vector<4x8xbf16>, vector<256x8xf32> -> vector<256x8xf32>
    %19 = arith.addf %13, %18 : vector<256x8xf32>
    %20 = vector.extract_strided_slice %2 {offsets = [1, 0, 0], sizes = [16, 16, 4], strides = [1, 1, 1]} : vector<18x18x4xbf16> to vector<16x16x4xbf16>
    %21 = vector.shape_cast %20 : vector<16x16x4xbf16> to vector<256x4xbf16>
    %c1_17 = arith.constant 1 : index
    %c0_18 = arith.constant 0 : index
    %c0_19 = arith.constant 0 : index
    %c0_20 = arith.constant 0 : index
    %22 = vector.load %arg3[%c1_17, %c0_18, %c0_19, %c0_20] : memref<3x3x4x8xbf16, #tpu.memory_space<vmem>>, vector<1x1x4x8xbf16>
    %23 = vector.shape_cast %22 : vector<1x1x4x8xbf16> to vector<4x8xbf16>
    %cst_21 = arith.constant dense<0.000000e+00> : vector<256x8xf32>
    %24 = tpu.matmul %21, %23, %cst_21 {dimension_numbers = #tpu.dot_dimension_numbers<[1], [0], [0], [1], [0, 0, 1, 1], [], []>} : vector<256x4xbf16>, vector<4x8xbf16>, vector<256x8xf32> -> vector<256x8xf32>
    %25 = arith.addf %19, %24 : vector<256x8xf32>
    %26 = vector.extract_strided_slice %2 {offsets = [1, 1, 0], sizes = [16, 16, 4], strides = [1, 1, 1]} : vector<18x18x4xbf16> to vector<16x16x4xbf16>
    %27 = vector.shape_cast %26 : vector<16x16x4xbf16> to vector<256x4xbf16>
    %c1_22 = arith.constant 1 : index
    %c1_23 = arith.constant 1 : index
    %c0_24 = arith.constant 0 : index
    %c0_25 = arith.constant 0 : index
    %28 = vector.load %arg3[%c1_22, %c1_23, %c0_24, %c0_25] : memref<3x3x4x8xbf16, #tpu.memory_space<vmem>>, vector<1x1x4x8xbf16>
    %29 = vector.shape_cast %28 : vector<1x1x4x8xbf16> to vector<4x8xbf16>
    %cst_26 = arith.constant dense<0.000000e+00> : vector<256x8xf32>
    %30 = tpu.matmul %27, %29, %cst_26 {dimension_numbers = #tpu.dot_dimension_numbers<[1], [0], [0], [1], [0, 0, 1, 1], [], []>} : vector<256x4xbf16>, vector<4x8xbf16>, vector<256x8xf32> -> vector<256x8xf32>
    %31 = arith.addf %25, %30 : vector<256x8xf32>
    %32 = vector.extract_strided_slice %2 {offsets = [1, 2, 0], sizes = [16, 16, 4], strides = [1, 1, 1]} : vector<18x18x4xbf16> to vector<16x16x4xbf16>
    %33 = vector.shape_cast %32 : vector<16x16x4xbf16> to vector<256x4xbf16>
    %c1_27 = arith.constant 1 : index
    %c2_28 = arith.constant 2 : index
    %c0_29 = arith.constant 0 : index
    %c0_30 = arith.constant 0 : index
    %34 = vector.load %arg3[%c1_27, %c2_28, %c0_29, %c0_30] : memref<3x3x4x8xbf16, #tpu.memory_space<vmem>>, vector<1x1x4x8xbf16>
    %35 = vector.shape_cast %34 : vector<1x1x4x8xbf16> to vector<4x8xbf16>
    %cst_31 = arith.constant dense<0.000000e+00> : vector<256x8xf32>
    %36 = tpu.matmul %33, %35, %cst_31 {dimension_numbers = #tpu.dot_dimension_numbers<[1], [0], [0], [1], [0, 0, 1, 1], [], []>} : vector<256x4xbf16>, vector<4x8xbf16>, vector<256x8xf32> -> vector<256x8xf32>
    %37 = arith.addf %31, %36 : vector<256x8xf32>
    %38 = vector.extract_strided_slice %2 {offsets = [2, 0, 0], sizes = [16, 16, 4], strides = [1, 1, 1]} : vector<18x18x4xbf16> to vector<16x16x4xbf16>
    %39 = vector.shape_cast %38 : vector<16x16x4xbf16> to vector<256x4xbf16>
    %c2_32 = arith.constant 2 : index
    %c0_33 = arith.constant 0 : index
    %c0_34 = arith.constant 0 : index
    %c0_35 = arith.constant 0 : index
    %40 = vector.load %arg3[%c2_32, %c0_33, %c0_34, %c0_35] : memref<3x3x4x8xbf16, #tpu.memory_space<vmem>>, vector<1x1x4x8xbf16>
    %41 = vector.shape_cast %40 : vector<1x1x4x8xbf16> to vector<4x8xbf16>
    %cst_36 = arith.constant dense<0.000000e+00> : vector<256x8xf32>
    %42 = tpu.matmul %39, %41, %cst_36 {dimension_numbers = #tpu.dot_dimension_numbers<[1], [0], [0], [1], [0, 0, 1, 1], [], []>} : vector<256x4xbf16>, vector<4x8xbf16>, vector<256x8xf32> -> vector<256x8xf32>
    %43 = arith.addf %37, %42 : vector<256x8xf32>
    %44 = vector.extract_strided_slice %2 {offsets = [2, 1, 0], sizes = [16, 16, 4], strides = [1, 1, 1]} : vector<18x18x4xbf16> to vector<16x16x4xbf16>
    %45 = vector.shape_cast %44 : vector<16x16x4xbf16> to vector<256x4xbf16>
    %c2_37 = arith.constant 2 : index
    %c1_38 = arith.constant 1 : index
    %c0_39 = arith.constant 0 : index
    %c0_40 = arith.constant 0 : index
    %46 = vector.load %arg3[%c2_37, %c1_38, %c0_39, %c0_40] : memref<3x3x4x8xbf16, #tpu.memory_space<vmem>>, vector<1x1x4x8xbf16>
    %47 = vector.shape_cast %46 : vector<1x1x4x8xbf16> to vector<4x8xbf16>
    %cst_41 = arith.constant dense<0.000000e+00> : vector<256x8xf32>
    %48 = tpu.matmul %45, %47, %cst_41 {dimension_numbers = #tpu.dot_dimension_numbers<[1], [0], [0], [1], [0, 0, 1, 1], [], []>} : vector<256x4xbf16>, vector<4x8xbf16>, vector<256x8xf32> -> vector<256x8xf32>
    %49 = arith.addf %43, %48 : vector<256x8xf32>
    %50 = vector.extract_strided_slice %2 {offsets = [2, 2, 0], sizes = [16, 16, 4], strides = [1, 1, 1]} : vector<18x18x4xbf16> to vector<16x16x4xbf16>
    %51 = vector.shape_cast %50 : vector<16x16x4xbf16> to vector<256x4xbf16>
    %c2_42 = arith.constant 2 : index
    %c2_43 = arith.constant 2 : index
    %c0_44 = arith.constant 0 : index
    %c0_45 = arith.constant 0 : index
    %52 = vector.load %arg3[%c2_42, %c2_43, %c0_44, %c0_45] : memref<3x3x4x8xbf16, #tpu.memory_space<vmem>>, vector<1x1x4x8xbf16>
    %53 = vector.shape_cast %52 : vector<1x1x4x8xbf16> to vector<4x8xbf16>
    %cst_46 = arith.constant dense<0.000000e+00> : vector<256x8xf32>
    %54 = tpu.matmul %51, %53, %cst_46 {dimension_numbers = #tpu.dot_dimension_numbers<[1], [0], [0], [1], [0, 0, 1, 1], [], []>} : vector<256x4xbf16>, vector<4x8xbf16>, vector<256x8xf32> -> vector<256x8xf32>
    %55 = arith.addf %49, %54 : vector<256x8xf32>
    %56 = vector.broadcast %0 : vector<1x8xf32> to vector<256x8xf32>
    %57 = arith.addf %55, %56 : vector<256x8xf32>
    %58 = vector.shape_cast %57 : vector<256x8xf32> to vector<16x16x8xf32>
    %c0_47 = arith.constant 0 : index
    %c0_48 = arith.constant 0 : index
    %c0_49 = arith.constant 0 : index
    %c0_50 = arith.constant 0 : index
    %59 = vector.load %arg5[%c0_47, %c0_48, %c0_49, %c0_50] : memref<1x16x16x8xf32, #tpu.memory_space<vmem>>, vector<1x16x16x8xf32>
    %60 = vector.shape_cast %59 : vector<1x16x16x8xf32> to vector<16x16x8xf32>
    %61 = vector.shape_cast %58 : vector<16x16x8xf32> to vector<1x16x16x8xf32>
    tpu.vector_store %arg5[%c0_47, %c0_48, %c0_49, %c0_50], %61 {strides = array<i32>} : memref<1x16x16x8xf32, #tpu.memory_space<vmem>>, vector<1x16x16x8xf32>,
    return
  }
  func.func @transform_0(%arg0: i32, %arg1: i32) -> (i32, i32, i32, i32) {
    %c0_i32 = arith.constant 0 : i32
    %c0_i32_0 = arith.constant 0 : i32
    %c0_i32_1 = arith.constant 0 : i32
    %c0_i32_2 = arith.constant 0 : i32
    return %arg0, %c0_i32, %c0_i32_0, %c0_i32_1 : i32, i32, i32, i32
  }
  func.func @transform_1(%arg0: i32, %arg1: i32) -> (i32, i32, i32, i32) {
    %c0_i32 = arith.constant 0 : i32
    %c0_i32_0 = arith.constant 0 : i32
    %c0_i32_1 = arith.constant 0 : i32
    %c0_i32_2 = arith.constant 0 : i32
    return %c0_i32, %c0_i32_0, %c0_i32_1, %arg1 : i32, i32, i32, i32
  }
  func.func @transform_2(%arg0: i32, %arg1: i32) -> (i32, i32) {
    %c0_i32 = arith.constant 0 : i32
    %c0_i32_0 = arith.constant 0 : i32
    return %c0_i32, %arg1 : i32, i32
  }
  func.func @transform_3(%arg0: i32, %arg1: i32) -> (i32, i32, i32, i32) {
    %c0_i32 = arith.constant 0 : i32
    %c0_i32_0 = arith.constant 0 : i32
    %c0_i32_1 = arith.constant 0 : i32
    return %arg0, %c0_i32, %c0_i32_0, %arg1 : i32, i32, i32, i32
  }
}

</mosaic_0001>

<bundles_post_ra>
// kernel: conv3x3_pallas.1
= control target key start
LH: loop header
LB: loop body
LE: loop exit
PB: predicated region body
PF: predicated region fallthrough
CT: control target
= control target key end

     0   :  { %s4171_s12 = smov 0   ;;  %s4173_s13 = smov 0   ;;  %s5260_s0 = inlined_call_operand.vmem [shape: bf16[2,18,18,4], index: 0, kind: input, shape index: {}]   ;;  %s5261_s1 = inlined_call_operand.vmem [shape: bf16[3,3,4,8], index: 1, kind: input, shape index: {}]   ;;  %s5262_s2 = inlined_call_operand.vmem [shape: f32[1,8], index: 2, kind: input, shape index: {}]   ;;  %s5263_s3 = inlined_call_operand.vmem [shape: f32[2,16,16,8], index: 3, kind: output, shape index: {}]  }
   0x1   :  { %s4175_s14 = smov 0  }
   0x2 LB: > { %s25_s15 = sadd.s32 1, %s4145_s13  ;;  %p3121_p0 = scmp.ge.s32.totalorder %s4149_s14, 1  ;;  %s4149_s14 = sphi %s4175_s14, %s13_s14   ;;  %s4145_s13 = sphi %s4173_s13, %s5342_s13   ;;  %s4141_s12 = sphi %s4171_s12, %s5341_s12  }
   0x3   : > { %p27_p1 = scmp.ge.s32.totalorder %s25_s15, 2  ;;  %p168_p2 = scmp.lt.s32.totalorder %s4149_s14, 3 }
   0x5   : > { %s5344_s15 = smov (%p27_p1, %s25_s15), 0  ;;  %p169_p3 = pnand %p3121_p0, %p168_p2 }
   0x7   : > { %172 = sbr.rel (%p169_p3) target bundleno = 552 (0x228), region = 32 }
   0xe   : > { %v3125_v0 = vld [vmem:[%s5261_s1 + $0x2] sm:$0x3]  ;;  %vm765_vm0 = vcmask 1041408   ;;  %v3257_v1 = vld [vmem:[%s5261_s1 + $0x8] sm:$0x3]  ;;  %p202_p4 = scmp.lt.s32.totalorder %s4141_s12, 1 }
   0xf   : > { %4070 = vmatprep.subr.msk.bf16.mxu1 %vm765_vm0, %v3125_v0  ;;  %4074 = vmatprep.subr.msk.bf16.mxu0 %vm765_vm0, %v3257_v1  ;;  %v767_v2 = vsel %vm765_vm0, %v3125_v0, 0  ;;  %v4199_v3 = vsel %vm765_vm0, %v3257_v1, 0  ;;  %v278_v4 = vld [vmem:[%s5261_s1] sm:$0x3]  ;;  %v3276_v5 = vld [vmem:[%s5261_s1 + $0xa] sm:$0x3] }
  0x10   : > { %5295 = vst [vmem:[#allocation2_spill] sm:$0xff] %v4199_v3  ;;  %3507 = vmatpush3.bf16.msra.mxu1 %v767_v2  ;;  %3643 = vmatpush3.bf16.msra.mxu0 %v4199_v3  ;;  %s5346_s12 = smov (!%p202_p4, %s4141_s12), 1  ;;  %vm279_vm1 = vsmask.f32 3328  ;;  %vm280_vm2 = vsmask.f32 7440 }
  0x11   : > { %4071 = vmatprep.subr.msk.bf16.mxu1 %vm765_vm0, %v278_v4  ;;  %4076 = vmatprep.subr.msk.bf16.mxu0 %vm765_vm0, %v3276_v5  ;;  %s4080_s24 = smul.u32 216, %s5346_s12  ;;  %v4219_v6 = vsel %vm765_vm0, %v278_v4, 0  ;;  %v4222_v7 = vsel %vm765_vm0, %v3276_v5, 0  ;;  %v4227_v8 = vld [vmem:[%s5261_s1 + $0xc] sm:$0x3]  ;;  %vm716_vm3 = vcmask 31744   ;;  %vm4263_vm4 = vmor %vm279_vm1, %vm280_vm2 }
  0x12   : > { %v4251_v20 = vsel %vm765_vm0, %v4227_v8, 0  ;;  %vm1238_vm5 = vcmask 1042432   ;;  %vm1239_vm6 = vcmask 1046532   ;;  %s3352_s17 = sshll.u32 %s5346_s12, 8  ;;  %vm2977_vm8 = vcmask 64512  }
  0x13   : > { %s4216_s27 = scalar_lea.vmem %s5260_s0, %s4080_s24  ;;  %vm4444_vm7 = vmor %vm1238_vm5, %vm1239_vm6  ;;  %s5153_s22 = scalar_lea.vmem %s5263_s3, %s3352_s17 }
  0x14   : > { %v4230_v9 = vld [vmem:[%s4216_s27] sm:$0xf]  ;;  %v4233_v10 = vld [vmem:[%s4216_s27 + $0x4] sm:$0xf]  ;;  %v226_v11 = vld [vmem:[%s4216_s27 + $0x8] sm:$0x1] }
  0x15   : > { %v283_v12 = vshrl.u32 %v4230_v9, 16  ;;  %v286_v13 = vshll.u32 %v4230_v9, 16  ;;  %v292_v14 = vshll.u32 %v4233_v10, 16  ;;  %v296_v15 = vshrl.u32 %v4233_v10, 16  ;;  %v4241_v16 = vld [vmem:[%s4216_s27 + $0xc] sm:$0xf] }
  0x16   : > { %v302_v17 = vshll.u32 %v226_v11, 16  ;;  %v4244_v18 = vld [vmem:[%s4216_s27 + $0x10] sm:$0xf]  ;;  %v4247_v19 = vld [vmem:[%s4216_s27 + $0x14] sm:$0x1]  ;;  %v307_v26 = vshrl.u32 %v4241_v16, 16 }
  0x17   : > { %v285_v21 = vrot.slane %v283_v12, 4  ;;  %v288_v22 = vrot.slane %v286_v13, 5  ;;  %v294_v23 = vrot.slane %v292_v14, 5  ;;  %v298_v24 = vrot.slane %v296_v15, 4  ;;  %v4259_v33 = vld [vmem:[%s4216_s27 + $0x18] sm:$0xf] }
  0x18   : > { %v304_v25 = vrot.slane %v302_v17, 5  ;;  %v310_v27 = vshll.u32 %v4241_v16, 16  ;;  %v316_v28 = vshll.u32 %v4244_v18, 16  ;;  %v320_v31 = vshrl.u32 %v4244_v18, 16  ;;  %v4272_v39 = vld [vmem:[%s4216_s27 + $0x1c] sm:$0xf] }
  0x19   : > { %v289_v29 = vor.u32 %v288_v22, %v285_v21  ;;  %v299_v30 = vor.u32 %v298_v24, %v294_v23  ;;  %v326_v32 = vshll.u32 %v4247_v19, 16  ;;  %v309_v35 = vrot.slane %v307_v26, 4  ;;  %v4276_v46 = vld [vmem:[%s4216_s27 + $0x20] sm:$0x1]  ;;  %v4286_v57 = vld [vmem:[%s4216_s27 + $0x24] sm:$0xf] }
  0x1a   : > { %v312_v36 = vrot.slane %v310_v27, 5  ;;  %v318_v37 = vrot.slane %v316_v28, 5  ;;  %v4269_v38 = vcombine.low %v4241_v16, %v4244_v18  ;;  %v322_v42 = vrot.slane %v320_v31, 4  ;;  %v4291_v62 = vld [vmem:[%s4216_s27 + $0x28] sm:$0xf] }
  0x1b   : > { %v290_v40 = vrot.slane %v289_v29, 4  ;;  %v300_v41 = vrot.slane %v299_v30, 4  ;;  %v328_v43 = vrot.slane %v326_v32, 5  ;;  %v1253_v45 = vrot.slane %v4247_v19, 5  ;;  %v4299_v4 = vld [vmem:[%s4216_s27 + $0x2c] sm:$0x1] }
  0x1c   : > { %v313_v44 = vor.u32 %v312_v36, %v309_v35  ;;  %v331_v47 = vshrl.u32 %v4259_v33, 16  ;;  %v334_v48 = vshll.u32 %v4259_v33, 16  ;;  %v323_v51 = vor.u32 %v322_v42, %v318_v37  ;;  %v4305_v14 = vld [vmem:[%s4216_s27 + $0x30] sm:$0xf]  ;;  %v4317_v28 = vld [vmem:[%s4216_s27 + $0x34] sm:$0xf] }
  0x1d   : > { %v295_v49 = vsel %vm4263_vm4, %v290_v40, %v294_v23  ;;  %v305_v50 = vsel %vm4263_vm4, %v300_v41, %v304_v25  ;;  %v340_v52 = vshll.u32 %v4272_v39, 16  ;;  %v344_v60 = vshrl.u32 %v4272_v39, 16  ;;  %v4312_v23 = vld [vmem:[%s5261_s1 + $0x4] sm:$0x3]  ;;  %v4324_v32 = vld [vmem:[%s4216_s27 + $0x38] sm:$0x1] }
  0x1e   : > { %v3126_v53 = vcombine.low %v295_v49, %v305_v50  ;;  %v314_v54 = vrot.slane %v313_v44, 4  ;;  %v333_v55 = vrot.slane %v331_v47, 4  ;;  %v336_v56 = vrot.slane %v334_v48, 5  ;;  %v4332_v48 = vld [vmem:[%s4216_s27 + $0x3c] sm:$0xf] }
  0x1f   : > { %v324_v58 = vrot.slane %v323_v51, 4  ;;  %v342_v59 = vrot.slane %v340_v52, 5  ;;  %v350_v61 = vshll.u32 %v4276_v46, 16  ;;  %v1257_v1 = vrot.slane %v4272_v39, 5  ;;  %v4340_v52 = vld [vmem:[%s4216_s27 + $0x40] sm:$0xf] }
  0x20   : > { %3508 = vmatprep.mubr.msk.bf16.mxu1 %vm716_vm3, %v3126_v53  ;;  %v319_v63 = vsel %vm4263_vm4, %v314_v54, %v318_v37  ;;  %v337_v0 = vor.u32 %v336_v56, %v333_v55  ;;  %v1260_v2 = vrot.slane %v4276_v46, 5  ;;  %v346_v11 = vrot.slane %v344_v60, 4 }
  0x21   : > { %v329_v5 = vsel %vm4263_vm4, %v324_v58, %v328_v43  ;;  %v352_v12 = vrot.slane %v350_v61, 5  ;;  %v355_v13 = vshrl.u32 %v4286_v57, 16  ;;  %v358_v21 = vshll.u32 %v4286_v57, 16 }
  0x22   : > { %v3127_v15 = vcombine.low %v319_v63, %v329_v5  ;;  %v338_v17 = vrot.slane %v337_v0, 4  ;;  %v364_v22 = vshll.u32 %v4291_v62, 16  ;;  %v347_v24 = vor.u32 %v346_v11, %v342_v59  ;;  %v4352_v5 = vld [vmem:[%s4216_s27 + $0x44] sm:$0x1] }
  0x23   : > { %v357_v25 = vrot.slane %v355_v13, 4  ;;  %v368_v26 = vshrl.u32 %v4291_v62, 16  ;;  %v374_v27 = vshll.u32 %v4299_v4, 16  ;;  %v360_v30 = vrot.slane %v358_v21, 5  ;;  %v4357_v13 = vld [vmem:[%s4216_s27 + $0x48] sm:$0xf] }
  0x24   : > { %3644 = vmatprep.mubr.msk.bf16.mxu0 %vm716_vm3, %v3127_v15  ;;  %3509 = vmatmul.mubr.msk.bf16.vlgmr.msra.gmra.mrb[0].mxu1 %vm716_vm3, %v3127_v15  ;;  %v343_v29 = vsel %vm4263_vm4, %v338_v17, %v342_v59  ;;  %v366_v31 = vrot.slane %v364_v22, 5  ;;  %v379_v35 = vshrl.u32 %v4305_v14, 16  ;;  %v348_v36 = vrot.slane %v347_v24, 4  ;;  %v4364_v24 = vld [vmem:[%s4216_s27 + $0x4c] sm:$0xf] }
  0x25   : > { %3541 = vmatpush3.bf16.msra.mxu1 %v4219_v6  ;;  %v370_v37 = vrot.slane %v368_v26, 4  ;;  %v376_v40 = vrot.slane %v374_v27, 5  ;;  %v382_v41 = vshll.u32 %v4305_v14, 16  ;;  %v361_v42 = vor.u32 %v360_v30, %v357_v25 }
  0x26   : > { %v381_v43 = vrot.slane %v379_v35, 4  ;;  %v388_v44 = vshll.u32 %v4317_v28, 16  ;;  %v392_v47 = vshrl.u32 %v4317_v28, 16  ;;  %4072 = vmatprep.subr.msk.bf16.mxu1 %vm765_vm0, %v4312_v23  ;;  %v353_v49 = vsel %vm4263_vm4, %v348_v36, %v352_v12 }
  0x27   : > { %v371_v6 = vor.u32 %v370_v37, %v366_v31  ;;  %v384_v50 = vrot.slane %v382_v41, 5  ;;  %v398_v51 = vshll.u32 %v4324_v32, 16  ;;  %v4342_v53 = vcombine.low %v343_v29, %v353_v49 }
  0x28   : > { %v362_v54 = vrot.slane %v361_v42, 4  ;;  %v390_v55 = vrot.slane %v388_v44, 5  ;;  %v394_v56 = vrot.slane %v392_v47, 4  ;;  %v403_v61 = vshrl.u32 %v4332_v48, 16  ;;  %v4386_v42 = vld [vmem:[%s4216_s27 + $0x54] sm:$0xf] }
  0x29   : > { %5298 = vst [vmem:[#allocation3_spill] sm:$0xff] %v4342_v53  ;;  %v372_v58 = vrot.slane %v371_v6, 4  ;;  %v385_v59 = vor.u32 %v384_v50, %v381_v43  ;;  %v400_v60 = vrot.slane %v398_v51, 5  ;;  %3645 = vmatmul.mubr.msk.bf16.vlgmr.msra.gmra.mrb[0].mxu0 %vm716_vm3, %v4342_v53  ;;  %3512 = vmatprep.mubr.msk.bf16.mxu1 %vm716_vm3, %v4342_v53  ;;  %v406_v11 = vshll.u32 %v4332_v48, 16  ;;  %5300 = vst [vmem:[#allocation5_spill] sm:$0xff] %v4386_v42 }
  0x2a   : > { %v367_v63 = vsel %vm4263_vm4, %v362_v54, %v366_v31  ;;  %v395_v0 = vor.u32 %v394_v56, %v390_v55  ;;  %v412_v12 = vshll.u32 %v4340_v52, 16  ;;  %3677 = vmatpush3.bf16.msra.mxu0 %v4222_v7  ;;  %v405_v21 = vrot.slane %v403_v61, 4  ;;  %v4391_v6 = vld [vmem:[%s4216_s27 + $0x58] sm:$0xf] }
  0x2b   : > { %v377_v15 = vsel %vm4263_vm4, %v372_v58, %v376_v40  ;;  %v386_v17 = vrot.slane %v385_v59, 4  ;;  %v416_v22 = vshrl.u32 %v4340_v52, 16  ;;  %v408_v27 = vrot.slane %v406_v11, 5  ;;  %4077 = vmatprep.subr.msk.bf16.mxu0 %vm765_vm0, %v4227_v8  ;;  %v4381_v8 = vld [vmem:[%s4216_s27 + $0x50] sm:$0x1] }
  0x2c   : > { %v4366_v25 = vcombine.low %v367_v63, %v377_v15  ;;  %v396_v26 = vrot.slane %v395_v0, 4  ;;  %v414_v29 = vrot.slane %v412_v12, 5  ;;  %v422_v31 = vshll.u32 %v4352_v5, 16  ;;  %v4404_v11 = vld [vmem:[%s4216_s27 + $0x5c] sm:$0x1] }
  0x2d   : > { %v391_v7 = vsel %vm4263_vm4, %v386_v17, %v390_v55  ;;  %v418_v30 = vrot.slane %v416_v22, 4  ;;  %v427_v35 = vshrl.u32 %v4357_v13, 16  ;;  %v409_v37 = vor.u32 %v408_v27, %v405_v21  ;;  %v4408_v15 = vld [vmem:[%s4216_s27 + $0x60] sm:$0xf]  ;;  %v4413_v27 = vld [vmem:[%s4216_s27 + $0x64] sm:$0xf] }
  0x2e   : > { %5299 = vst [vmem:[#allocation4_spill] sm:$0xff] %v4366_v25  ;;  %3648 = vmatprep.mubr.msk.bf16.mxu0 %vm716_vm3, %v4366_v25  ;;  %3513 = vmatmul.mubr.msk.bf16.gmra.mrb[4].mxu1 %vm716_vm3, %v4366_v25  ;;  %v401_v36 = vsel %vm4263_vm4, %v396_v26, %v400_v60  ;;  %v430_v40 = vshll.u32 %v4357_v13, 16  ;;  %v436_v41 = vshll.u32 %v4364_v24, 16  ;;  %v424_v47 = vrot.slane %v422_v31, 5  ;;  %v4625_v25 = vld [vmem:[%s4216_s27 + $0xa8] sm:$0xf] }
  0x2f   : > { %v4388_v43 = vcombine.low %v391_v7, %v401_v36  ;;  %v419_v44 = vor.u32 %v418_v30, %v414_v29  ;;  %v429_v49 = vrot.slane %v427_v35, 4  ;;  %v410_v50 = vrot.slane %v409_v37, 4 }
  0x30   : > { %v432_v51 = vrot.slane %v430_v40, 5  ;;  %v438_v54 = vrot.slane %v436_v41, 5  ;;  %v440_v55 = vshrl.u32 %v4364_v24, 16  ;;  %v446_v58 = vshll.u32 %v4381_v8, 16 }
  0x31   : > { %5301 = vst [vmem:[#allocation6_spill] sm:$0xff] %v4388_v43  ;;  %3516 = vmatprep.mubr.msk.bf16.mxu1 %vm716_vm3, %v4388_v43  ;;  %v420_v56 = vrot.slane %v419_v44, 4  ;;  %v451_v59 = vshrl.u32 %v4386_v42, 16  ;;  %v454_v60 = vshll.u32 %v4386_v42, 16  ;;  %3649 = vmatmul.mubr.msk.bf16.gmra.mrb[4].mxu0 %vm716_vm3, %v4388_v43  ;;  %v415_v61 = vsel %vm4263_vm4, %v410_v50, %v414_v29 }
  0x32   : > { %v433_v63 = vor.u32 %v432_v51, %v429_v49  ;;  %v442_v0 = vrot.slane %v440_v55, 4  ;;  %v460_v12 = vshll.u32 %v4391_v6, 16  ;;  %v448_v21 = vrot.slane %v446_v58, 5 }
  0x33   : > { %v425_v17 = vsel %vm4263_vm4, %v420_v56, %v424_v47  ;;  %v453_v22 = vrot.slane %v451_v59, 4  ;;  %v456_v26 = vrot.slane %v454_v60, 5  ;;  %v464_v36 = vshrl.u32 %v4391_v6, 16  ;;  %v4427_v47 = vld [vmem:[%s4216_s27 + $0x68] sm:$0x1] }
  0x34   : > { %v4415_v7 = vcombine.low %v415_v61, %v425_v17  ;;  %v434_v29 = vrot.slane %v433_v63, 4  ;;  %v443_v30 = vor.u32 %v442_v0, %v438_v54  ;;  %v462_v31 = vrot.slane %v460_v12, 5 }
  0x35   : > { %v457_v35 = vor.u32 %v456_v26, %v453_v22  ;;  %v470_v37 = vshll.u32 %v4404_v11, 16  ;;  %v475_v40 = vshrl.u32 %v4408_v15, 16  ;;  %v478_v49 = vshll.u32 %v4408_v15, 16 }
  0x36   : > { %5302 = vst [vmem:[#allocation7_spill] sm:$0xff] %v4415_v7  ;;  %3652 = vmatprep.mubr.msk.bf16.mxu0 %vm716_vm3, %v4415_v7  ;;  %3517 = vmatmul.mubr.msk.bf16.gmra.mrb[8].mxu1 %vm716_vm3, %v4415_v7  ;;  %v439_v41 = vsel %vm4263_vm4, %v434_v29, %v438_v54  ;;  %v444_v44 = vrot.slane %v443_v30, 4  ;;  %v484_v50 = vshll.u32 %v4413_v27, 16  ;;  %v466_v55 = vrot.slane %v464_v36, 4  ;;  %v4435_v54 = vld [vmem:[%s4216_s27 + $0x6c] sm:$0xf] }
  0x37   : > { %v458_v51 = vrot.slane %v457_v35, 4  ;;  %v472_v56 = vrot.slane %v470_v37, 5  ;;  %v477_v58 = vrot.slane %v475_v40, 4  ;;  %v480_v60 = vrot.slane %v478_v49, 5  ;;  %v4451_v36 = vld [vmem:[%s4216_s27 + $0x70] sm:$0xf] }
  0x38   : > { %v449_v59 = vsel %vm4263_vm4, %v444_v44, %v448_v21  ;;  %v486_v61 = vrot.slane %v484_v50, 5  ;;  %v488_v63 = vshrl.u32 %v4413_v27, 16  ;;  %v467_v17 = vor.u32 %v466_v55, %v462_v31  ;;  %v4602_v7 = vld [vmem:[%s4216_s27 + $0xa0] sm:$0xf] }
  0x39   : > { %v4437_v0 = vcombine.low %v439_v41, %v449_v59  ;;  %v463_v12 = vsel %vm4263_vm4, %v458_v51, %v462_v31  ;;  %v494_v22 = vshll.u32 %v4427_v47, 16  ;;  %v481_v21 = vor.u32 %v480_v60, %v477_v58  ;;  %v4464_v51 = vld [vmem:[%s4216_s27 + $0x74] sm:$0x1] }
  0x3a   : > { %v490_v29 = vrot.slane %v488_v63, 4  ;;  %v3191_v30 = vrot.slane %v4241_v16, 9  ;;  %v1250_v35 = vrot.slane %v4244_v18, 5  ;;  %v468_v31 = vrot.slane %v467_v17, 4 }
  0x3b   : > { %5303 = vst [vmem:[#allocation8_spill] sm:$0xff] %v4437_v0  ;;  %3653 = vmatmul.mubr.msk.bf16.gmra.mrb[8].mxu0 %vm716_vm3, %v4437_v0  ;;  %3520 = vmatprep.mubr.msk.bf16.mxu1 %vm716_vm3, %v4437_v0  ;;  %v496_v37 = vrot.slane %v494_v22, 5  ;;  %v499_v40 = vshrl.u32 %v4435_v54, 16  ;;  %v502_v41 = vshll.u32 %v4435_v54, 16  ;;  %v482_v44 = vrot.slane %v481_v21, 4 }
  0x3c   : > { %v491_v49 = vor.u32 %v490_v29, %v486_v61  ;;  %v1251_v16 = vsel %vm4444_vm7, %v3191_v30, %v1250_v35  ;;  %v1252_v18 = vrot.slane %v1250_v35, 4  ;;  %v473_v50 = vsel %vm4263_vm4, %v468_v31, %v472_v56  ;;  %v4476_v56 = vld [vmem:[%s4216_s27 + $0x78] sm:$0xf]  ;;  %v4492_v31 = vld [vmem:[%s4216_s27 + $0x7c] sm:$0xf] }
  0x3d   : > { %v501_v55 = vrot.slane %v499_v40, 4  ;;  %v504_v58 = vrot.slane %v502_v41, 5  ;;  %v508_v59 = vshll.u32 %v4451_v36, 16  ;;  %v4467_v60 = vcombine.low %v463_v12, %v473_v50 }
  0x3e   : > { %v487_v63 = vsel %vm4263_vm4, %v482_v44, %v486_v61  ;;  %v492_v17 = vrot.slane %v491_v49, 4  ;;  %v1254_v22 = vsel %vm4444_vm7, %v1252_v18, %v1253_v45  ;;  %v512_v35 = vshrl.u32 %v4451_v36, 16  ;;  %v4497_v49 = vld [vmem:[%s4216_s27 + $0x80] sm:$0x1] }
  0x3f   : > { %5306 = vst [vmem:[#allocation9_spill] sm:$0xff] %v4467_v60  ;;  %v4478_v21 = vcombine.low %v1251_v16, %v1254_v22  ;;  %v505_v29 = vor.u32 %v504_v58, %v501_v55  ;;  %v510_v30 = vrot.slane %v508_v59, 5  ;;  %3656 = vmatprep.mubr.msk.bf16.mxu0 %vm716_vm3, %v4467_v60  ;;  %3521 = vmatmul.mubr.msk.bf16.gmra.mrb[12].mxu1 %vm716_vm3, %v4467_v60  ;;  %v518_v45 = vshll.u32 %v4464_v51, 16  ;;  %v4595_v60 = vld [vmem:[%s4216_s27 + $0x9c] sm:$0xf] }
  0x40   : > { %v497_v19 = vsel %vm4263_vm4, %v492_v17, %v496_v37  ;;  %v3192_v61 = vrot.slane %v4259_v33, 9  ;;  %v1259_v12 = vrot.slane %v1257_v1, 4  ;;  %v514_v44 = vrot.slane %v512_v35, 4 }
  0x41   : > { %5307 = vst [vmem:[#allocation10_spill] sm:$0xff] %v4478_v21  ;;  %v4494_v40 = vcombine.low %v487_v63, %v497_v19  ;;  %v506_v41 = vrot.slane %v505_v29, 4  ;;  %v523_v16 = vshrl.u32 %v4476_v56, 16  ;;  %v520_v18 = vrot.slane %v518_v45, 5  ;;  %v4523_v29 = vld [vmem:[%s4216_s27 + $0x84] sm:$0xf] }
  0x42   : > { %v1258_v37 = vsel %vm4444_vm7, %v3192_v61, %v1257_v1  ;;  %v1261_v50 = vsel %vm4444_vm7, %v1259_v12, %v1260_v2  ;;  %v526_v55 = vshll.u32 %v4476_v56, 16  ;;  %v515_v59 = vor.u32 %v514_v44, %v510_v30 }
  0x43   : > { %5308 = vst [vmem:[#allocation11_spill] sm:$0xff] %v4494_v40  ;;  %3657 = vmatmul.mubr.msk.bf16.gmra.mrb[12].mxu0 %vm716_vm3, %v4494_v40  ;;  %3524 = vmatprep.mubr.msk.bf16.mxu1 %vm716_vm3, %v4494_v40  ;;  %v511_v58 = vsel %vm4263_vm4, %v506_v41, %v510_v30  ;;  %v4515_v63 = vcombine.low %v1258_v37, %v1261_v50  ;;  %v525_v1 = vrot.slane %v523_v16, 4  ;;  %v532_v2 = vshll.u32 %v4492_v31, 16  ;;  %v4529_v16 = vld [vmem:[%s4216_s27 + $0x88] sm:$0xf] }
  0x44   : > { %3678 = vmatprep.mubr.msk.bf16.mxu0 %vm716_vm3, %v4478_v21  ;;  %v528_v46 = vrot.slane %v526_v55, 5  ;;  %v536_v17 = vshrl.u32 %v4492_v31, 16  ;;  %v542_v22 = vshll.u32 %v4497_v49, 16  ;;  %v516_v35 = vrot.slane %v515_v59, 4 }
  0x45   : > { %5309 = vst [vmem:[#allocation12_spill] sm:$0xff] %v4515_v63  ;;  %v3193_v30 = vrot.slane %v4286_v57, 9  ;;  %v1264_v19 = vrot.slane %v4291_v62, 5  ;;  %v1267_v45 = vrot.slane %v4299_v4, 5  ;;  %v534_v12 = vrot.slane %v532_v2, 5 }
  0x46   : > { %v529_v61 = vor.u32 %v528_v46, %v525_v1  ;;  %v538_v41 = vrot.slane %v536_v17, 4  ;;  %v544_v44 = vrot.slane %v542_v22, 5  ;;  %v521_v37 = vsel %vm4263_vm4, %v516_v35, %v520_v18  ;;  %v4539_v1 = vld [vmem:[%s4216_s27 + $0x8c] sm:$0x1] }
  0x47   : > { %v1265_v50 = vsel %vm4444_vm7, %v3193_v30, %v1264_v19  ;;  %v1266_v55 = vrot.slane %v1264_v19, 4  ;;  %v547_v59 = vshrl.u32 %v4523_v29, 16  ;;  %v4536_v3 = vcombine.low %v511_v58, %v521_v37 }
  0x48   : > { %v530_v40 = vrot.slane %v529_v61, 4  ;;  %v539_v4 = vor.u32 %v538_v41, %v534_v12  ;;  %v550_v46 = vshll.u32 %v4523_v29, 16  ;;  %v556_v18 = vshll.u32 %v4529_v16, 16  ;;  %v4553_v61 = vld [vmem:[%s4216_s27 + $0x90] sm:$0xf] }
  0x49   : > { %5310 = vst [vmem:[#allocation13_spill] sm:$0xff] %v4536_v3  ;;  %v1268_v2 = vsel %vm4444_vm7, %v1266_v55, %v1267_v45  ;;  %v549_v17 = vrot.slane %v547_v59, 4  ;;  %v560_v22 = vshrl.u32 %v4529_v16, 16  ;;  %3525 = vmatmul.mubr.msk.bf16.gmra.mrb[16].mxu1 %vm716_vm3, %v4536_v3  ;;  %v4558_v45 = vld [vmem:[%s5261_s1 + $0xe] sm:$0x3]  ;;  %v1271_v59 = vrot.slane %v4317_v28, 5 }
  0x4a   : > { %v535_v58 = vsel %vm4263_vm4, %v530_v40, %v534_v12  ;;  %v540_v35 = vrot.slane %v539_v4, 4  ;;  %v4550_v30 = vcombine.low %v1265_v50, %v1268_v2  ;;  %v552_v19 = vrot.slane %v550_v46, 5  ;;  %5312 = vst [vmem:[#allocation15_spill] sm:$0xff] %v4558_v45  ;;  %v4572_v46 = vld [vmem:[%s4216_s27 + $0x94] sm:$0xf] }
  0x4b   : > { %3679 = vmatmul.mubr.msk.bf16.vlgmr.msra.gmra.mrb[0].mxu0 %vm716_vm3, %v4515_v63  ;;  %v558_v41 = vrot.slane %v556_v18, 5  ;;  %v562_v37 = vrot.slane %v560_v22, 4  ;;  %v566_v40 = vshll.u32 %v4539_v1, 16  ;;  %v3194_v12 = vrot.slane %v4305_v14, 9  ;;  %v4577_v3 = vld [vmem:[%s4216_s27 + $0x98] sm:$0x1] }
  0x4c   : > { %5311 = vst [vmem:[#allocation14_spill] sm:$0xff] %v4550_v30  ;;  %3711 = vmatpush3.bf16.msra.mxu0 %v4251_v20  ;;  %v545_v50 = vsel %vm4263_vm4, %v540_v35, %v544_v44  ;;  %3682 = vmatprep.mubr.msk.bf16.mxu0 %vm716_vm3, %v4550_v30  ;;  %v553_v55 = vor.u32 %v552_v19, %v549_v17  ;;  %v1274_v4 = vrot.slane %v4324_v32, 5  ;;  %v571_v20 = vshrl.u32 %v4553_v61, 16 }
  0x4d   : > { %v4574_v2 = vcombine.low %v535_v58, %v545_v50  ;;  %v563_v18 = vor.u32 %v562_v37, %v558_v41  ;;  %v568_v22 = vrot.slane %v566_v40, 5  ;;  %4078 = vmatprep.subr.msk.bf16.mxu0 %vm765_vm0, %v4558_v45  ;;  %v1272_v17 = vsel %vm4444_vm7, %v3194_v12, %v1271_v59 }
  0x4e   : > { %v554_v44 = vrot.slane %v553_v55, 4  ;;  %v1273_v35 = vrot.slane %v1271_v59, 4  ;;  %v574_v32 = vshll.u32 %v4553_v61, 16  ;;  %v573_v19 = vrot.slane %v571_v20, 4 }
  0x4f   : > { %5313 = vst [vmem:[#allocation16_spill] sm:$0xff] %v4574_v2  ;;  %3528 = vmatprep.mubr.msk.bf16.mxu1 %vm716_vm3, %v4574_v2  ;;  %v564_v58 = vrot.slane %v563_v18, 4  ;;  %v580_v37 = vshll.u32 %v4572_v46, 16  ;;  %v584_v40 = vshrl.u32 %v4572_v46, 16  ;;  %v590_v59 = vshll.u32 %v4577_v3, 16 }
  0x50   : > { %v559_v50 = vsel %vm4263_vm4, %v554_v44, %v558_v41  ;;  %v1275_v55 = vsel %vm4444_vm7, %v1273_v35, %v1274_v4  ;;  %v576_v12 = vrot.slane %v574_v32, 5  ;;  %v3195_v4 = vrot.slane %v4332_v48, 9 }
  0x51   : > { %v569_v2 = vsel %vm4263_vm4, %v564_v58, %v568_v22  ;;  %v4599_v18 = vcombine.low %v1272_v17, %v1275_v55  ;;  %v582_v20 = vrot.slane %v580_v37, 5  ;;  %v586_v0 = vrot.slane %v584_v40, 4  ;;  %v4615_v58 = vld [vmem:[%s4216_s27 + $0xa4] sm:$0x1] }
  0x52   : > { %v4604_v43 = vcombine.low %v559_v50, %v569_v2  ;;  %v577_v41 = vor.u32 %v576_v12, %v573_v19  ;;  %v592_v44 = vrot.slane %v590_v59, 5  ;;  %v1278_v32 = vrot.slane %v4340_v52, 5 }
  0x53   : > { %5314 = vst [vmem:[#allocation17_spill] sm:$0xff] %v4599_v18  ;;  %3683 = vmatmul.mubr.msk.bf16.gmra.mrb[4].mxu0 %vm716_vm3, %v4599_v18  ;;  %v587_v35 = vor.u32 %v586_v0, %v582_v20  ;;  %v1281_v22 = vrot.slane %v4352_v5, 5  ;;  %v595_v17 = vshrl.u32 %v4595_v60, 16  ;;  %v598_v19 = vshll.u32 %v4595_v60, 16 }
  0x54   : > { %5315 = vst [vmem:[#allocation18_spill] sm:$0xff] %v4604_v43  ;;  %3529 = vmatmul.mubr.msk.bf16.gmra.mrb[20].mxu1 %vm716_vm3, %v4604_v43  ;;  %v578_v2 = vrot.slane %v577_v41, 4  ;;  %v604_v37 = vshll.u32 %v4602_v7, 16  ;;  %v608_v0 = vshrl.u32 %v4602_v7, 16  ;;  %v1279_v5 = vsel %vm4444_vm7, %v3195_v4, %v1278_v32 }
  0x55   : > { %v588_v40 = vrot.slane %v587_v35, 4  ;;  %v1280_v50 = vrot.slane %v1278_v32, 4  ;;  %v597_v55 = vrot.slane %v595_v17, 4  ;;  %v600_v59 = vrot.slane %v598_v19, 5  ;;  %v4634_v32 = vld [vmem:[%s4216_s27 + $0xac] sm:$0xf] }
  0x56   : > { %v583_v12 = vsel %vm4263_vm4, %v578_v2, %v582_v20  ;;  %v606_v41 = vrot.slane %v604_v37, 5  ;;  %v610_v43 = vrot.slane %v608_v0, 4  ;;  %v614_v35 = vshll.u32 %v4615_v58, 16 }
  0x57   : > { %v593_v53 = vsel %vm4263_vm4, %v588_v40, %v592_v44  ;;  %v1282_v18 = vsel %vm4444_vm7, %v1280_v50, %v1281_v22  ;;  %v3196_v4 = vrot.slane %v4357_v13, 9  ;;  %v601_v2 = vor.u32 %v600_v59, %v597_v55 }
  0x58   : > { %v4636_v17 = vcombine.low %v583_v12, %v593_v53  ;;  %v4638_v20 = vcombine.low %v1279_v5, %v1282_v18  ;;  %v611_v19 = vor.u32 %v610_v43, %v606_v41  ;;  %v616_v37 = vrot.slane %v614_v35, 5  ;;  %v4648_v18 = vld [vmem:[%s4216_s27 + $0xb0] sm:$0x1] }
  0x59   : > { %v1285_v0 = vrot.slane %v4364_v24, 5  ;;  %v1288_v44 = vrot.slane %v4381_v8, 5  ;;  %v619_v22 = vshrl.u32 %v4625_v25, 16  ;;  %v602_v53 = vrot.slane %v601_v2, 4 }
  0x5a   : > { %5316 = vst [vmem:[#allocation19_spill] sm:$0xff] %v4636_v17  ;;  %5317 = vst [vmem:[#allocation20_spill] sm:$0xff] %v4638_v20  ;;  %3532 = vmatprep.mubr.msk.bf16.mxu1 %vm716_vm3, %v4636_v17  ;;  %3686 = vmatprep.mubr.msk.bf16.mxu0 %vm716_vm3, %v4638_v20  ;;  %v612_v40 = vrot.slane %v611_v19, 4  ;;  %v622_v43 = vshll.u32 %v4625_v25, 16  ;;  %v628_v5 = vshll.u32 %v4634_v32, 16  ;;  %v632_v12 = vshrl.u32 %v4634_v32, 16 }
  0x5b   : > { %v1286_v8 = vsel %vm4444_vm7, %v3196_v4, %v1285_v0  ;;  %v1287_v50 = vrot.slane %v1285_v0, 4  ;;  %v621_v55 = vrot.slane %v619_v22, 4  ;;  %v607_v59 = vsel %vm4263_vm4, %v602_v53, %v606_v41  ;;  %v4660_v17 = vld [vmem:[%s4216_s27 + $0xb4] sm:$0xf]  ;;  %v4672_v53 = vld [vmem:[%s4216_s27 + $0xb8] sm:$0xf] }
  0x5c   : > { %v617_v35 = vsel %vm4263_vm4, %v612_v40, %v616_v37  ;;  %v624_v2 = vrot.slane %v622_v43, 5  ;;  %v630_v19 = vrot.slane %v628_v5, 5  ;;  %v634_v0 = vrot.slane %v632_v12, 4 }
  0x5d   : > { %v4662_v20 = vcombine.low %v607_v59, %v617_v35  ;;  %v1289_v4 = vsel %vm4444_vm7, %v1287_v50, %v1288_v44  ;;  %v638_v22 = vshll.u32 %v4648_v18, 16  ;;  %v3197_v41 = vrot.slane %v4386_v42, 9  ;;  %v4678_v44 = vld [vmem:[%s4216_s27 + $0xbc] sm:$0x1] }
  0x5e   : > { %v4667_v30 = vcombine.low %v1286_v8, %v1289_v4  ;;  %v625_v63 = vor.u32 %v624_v2, %v621_v55  ;;  %v1292_v37 = vrot.slane %v4391_v6, 5  ;;  %v635_v40 = vor.u32 %v634_v0, %v630_v19 }
  0x5f   : > { %5318 = vst [vmem:[#allocation21_spill] sm:$0xff] %v4662_v20  ;;  %3533 = vmatmul.mubr.msk.bf16.gmra.mrb[24].mxu1 %vm716_vm3, %v4662_v20  ;;  %v640_v43 = vrot.slane %v638_v22, 5  ;;  %v1295_v5 = vrot.slane %v4404_v11, 5  ;;  %v643_v50 = vshrl.u32 %v4660_v17, 16  ;;  %v646_v59 = vshll.u32 %v4660_v17, 16 }
  0x60   : > { %5319 = vst [vmem:[#allocation22_spill] sm:$0xff] %v4667_v30  ;;  %3687 = vmatmul.mubr.msk.bf16.gmra.mrb[8].mxu0 %vm716_vm3, %v4667_v30  ;;  %v626_v8 = vrot.slane %v625_v63, 4  ;;  %v1293_v55 = vsel %vm4444_vm7, %v3197_v41, %v1292_v37  ;;  %v1294_v12 = vrot.slane %v1292_v37, 4  ;;  %v636_v35 = vrot.slane %v635_v40, 4 }
  0x61   : > { %v645_v2 = vrot.slane %v643_v50, 4  ;;  %v652_v4 = vshll.u32 %v4672_v53, 16  ;;  %v656_v11 = vshrl.u32 %v4672_v53, 16  ;;  %v648_v20 = vrot.slane %v646_v59, 5 }
  0x62   : > { %v631_v0 = vsel %vm4263_vm4, %v626_v8, %v630_v19  ;;  %v1296_v22 = vsel %vm4444_vm7, %v1294_v12, %v1295_v5  ;;  %v662_v63 = vshll.u32 %v4678_v44, 16  ;;  %v641_v41 = vsel %vm4263_vm4, %v636_v35, %v640_v43 }
  0x63   : > { %v4695_v37 = vcombine.low %v1293_v55, %v1296_v22  ;;  %v654_v40 = vrot.slane %v652_v4, 5  ;;  %v658_v50 = vrot.slane %v656_v11, 4  ;;  %v4697_v30 = vcombine.low %v631_v0, %v641_v41 }
  0x64   : > { %v649_v21 = vor.u32 %v648_v20, %v645_v2  ;;  %v664_v45 = vrot.slane %v662_v63, 5  ;;  %v3198_v42 = vrot.slane %v4408_v15, 9  ;;  %v1299_v5 = vrot.slane %v4413_v27, 5 }
  0x65   : > { %3690 = vmatprep.mubr.msk.bf16.mxu0 %vm716_vm3, %v4695_v37  ;;  %v659_v19 = vor.u32 %v658_v50, %v654_v40  ;;  %v1302_v8 = vrot.slane %v4427_v47, 5  ;;  %v3199_v43 = vrot.slane %v4435_v54, 9  ;;  %3536 = vmatprep.mubr.msk.bf16.mxu1 %vm716_vm3, %v4697_v30  ;;  %v3158_v20 = vcombine.low %v4230_v9, %v4233_v10 }
  0x66   : > { %v650_v55 = vrot.slane %v649_v21, 4  ;;  %v1306_v12 = vrot.slane %v4451_v36, 5  ;;  %v1309_v59 = vrot.slane %v4464_v51, 5  ;;  %v1300_v2 = vsel %vm4444_vm7, %v3198_v42, %v1299_v5 }
  0x67   : > { %v660_v35 = vrot.slane %v659_v19, 4  ;;  %v1301_v4 = vrot.slane %v1299_v5, 4  ;;  %v1313_v47 = vrot.slane %v4492_v31, 5  ;;  %v3200_v9 = vrot.slane %v4476_v56, 9 }
  0x68   : > { %v655_v11 = vsel %vm4263_vm4, %v650_v55, %v654_v40  ;;  %v1307_v21 = vsel %vm4444_vm7, %v3199_v43, %v1306_v12  ;;  %v1308_v0 = vrot.slane %v1306_v12, 4  ;;  %v1316_v42 = vrot.slane %v4497_v49, 5 }
  0x69   : > { %v665_v10 = vsel %vm4263_vm4, %v660_v35, %v664_v45  ;;  %v1303_v51 = vsel %vm4444_vm7, %v1301_v4, %v1302_v8  ;;  %v1315_v22 = vrot.slane %v1313_v47, 4  ;;  %v3201_v19 = vrot.slane %v4523_v29, 9 }
  0x6a   : > { %v4724_v63 = vcombine.low %v655_v11, %v665_v10  ;;  %v4726_v41 = vcombine.low %v1300_v2, %v1303_v51  ;;  %v1310_v40 = vsel %vm4444_vm7, %v1308_v0, %v1309_v59  ;;  %v1320_v5 = vrot.slane %v4529_v16, 5 }
  0x6b   : > { %v4730_v50 = vcombine.low %v1307_v21, %v1310_v40  ;;  %v1323_v49 = vrot.slane %v4539_v1, 5  ;;  %v1314_v45 = vsel %vm4444_vm7, %v3200_v9, %v1313_v47  ;;  %v1317_v8 = vsel %vm4444_vm7, %v1315_v22, %v1316_v42 }
  0x6c   : > { %3537 = vmatmul.mubr.msk.bf16.gmra.mrb[28].mxu1 %vm716_vm3, %v4724_v63  ;;  %3691 = vmatmul.mubr.msk.bf16.gmra.mrb[12].mxu0 %vm716_vm3, %v4726_v41  ;;  %v1322_v43 = vrot.slane %v1320_v5, 4  ;;  %v1327_v55 = vrot.slane %v4572_v46, 5  ;;  %v1334_v12 = vrot.slane %v4602_v7, 5  ;;  %v1321_v59 = vsel %vm4444_vm7, %v3201_v19, %v1320_v5 }
  0x6d   : > { %3542 = vmatprep.mubr.msk.bf16.mxu1 %vm716_vm3, %v3158_v20  ;;  %3694 = vmatprep.mubr.msk.bf16.mxu0 %vm716_vm3, %v4730_v50  ;;  %v4752_v20 = vcombine.low %v1314_v45, %v1317_v8  ;;  %v3202_v35 = vrot.slane %v4553_v61, 9  ;;  %v1330_v4 = vrot.slane %v4577_v3, 5  ;;  %v4758_v47 = vcombine.low %v4259_v33, %v4272_v39  ;;  %v4770_v3 = vld [vmem:[%s5261_s1 + $0x6] sm:$0x3] }
  0x6e   : > { %v1324_v1 = vsel %vm4444_vm7, %v1322_v43, %v1323_v49  ;;  %v1329_v2 = vrot.slane %v1327_v55, 4  ;;  %v3203_v11 = vrot.slane %v4595_v60, 9  ;;  %v1452_v21 = vsel %vm765_vm0, %v4312_v23, 0 }
  0x6f   : > { %v4763_v0 = vcombine.low %v1321_v59, %v1324_v1  ;;  %v1336_v9 = vrot.slane %v1334_v12, 4  ;;  %v1337_v10 = vrot.slane %v4615_v58, 5  ;;  %v1341_v51 = vrot.slane %v4634_v32, 5 }
  0x70   : > { %v1328_v33 = vsel %vm4444_vm7, %v3202_v35, %v1327_v55  ;;  %v1331_v39 = vsel %vm4444_vm7, %v1329_v2, %v1330_v4  ;;  %v4784_v23 = vcombine.low %v4286_v57, %v4291_v62  ;;  %v1335_v58 = vsel %vm4444_vm7, %v3203_v11, %v1334_v12 }
  0x71   : > { %v4790_v22 = vcombine.low %v4408_v15, %v4413_v27  ;;  %v1338_v42 = vsel %vm4444_vm7, %v1336_v9, %v1337_v10  ;;  %v3204_v40 = vrot.slane %v4625_v25, 9  ;;  %v1348_v19 = vrot.slane %v4672_v53, 5 }
  0x72   : > { %v4800_v57 = vcombine.low %v4435_v54, %v4451_v36  ;;  %v4804_v62 = vcombine.low %v1328_v33, %v1331_v39  ;;  %v1343_v15 = vrot.slane %v1341_v51, 4  ;;  %v1344_v27 = vrot.slane %v4648_v18, 5  ;;  %v274_v18 = vld [vmem:[%s4216_s27 + $0xc8] sm:$0x1] }
  0x73   : > { %v4809_v5 = vcombine.low %v4476_v56, %v4492_v31  ;;  %v4813_v49 = vcombine.low %v4523_v29, %v4529_v16  ;;  %v4817_v54 = vcombine.low %v4553_v61, %v4572_v46  ;;  %v4821_v36 = vcombine.low %v4595_v60, %v4602_v7  ;;  %v4840_v61 = vld [vmem:[%s4216_s27 + $0xc4] sm:$0xf] }
  0x74   : > { %3543 = vmatmul.mubr.msk.bf16.vlgmr.msra.gmra.mrb[0].mxu1 %vm716_vm3, %v4269_v38  ;;  %3695 = vmatmul.mubr.msk.bf16.gmra.mrb[16].mxu0 %vm716_vm3, %v4752_v20  ;;  %v4825_v45 = vcombine.low %v4625_v25, %v4634_v32  ;;  %v4829_v56 = vcombine.low %v4305_v14, %v4317_v28  ;;  %v4831_v31 = vcombine.low %v1335_v58, %v1338_v42  ;;  %v3205_v16 = vrot.slane %v4660_v17, 9  ;;  %v5320_v42 = vld [vmem:[#allocation5_spill] sm:$0xff] }
  0x75   : > { %3575 = vmatpush3.bf16.msra.mxu1 %v1452_v21  ;;  %3546 = vmatprep.mubr.msk.bf16.mxu1 %vm716_vm3, %v4758_v47  ;;  %v4835_v29 = vcombine.low %v4660_v17, %v4672_v53  ;;  %v1350_v7 = vrot.slane %v1348_v19, 4  ;;  %v1351_v60 = vrot.slane %v4678_v44, 5  ;;  %v1342_v14 = vsel %vm4444_vm7, %v3204_v40, %v1341_v51  ;;  %v4860_v17 = vld [vmem:[%s4216_s27 + $0xc0] sm:$0xf] }
  0x76   : > { %3698 = vmatprep.mubr.msk.bf16.mxu0 %vm716_vm3, %v4763_v0  ;;  %4073 = vmatprep.subr.msk.bf16.mxu1 %vm765_vm0, %v4770_v3  ;;  %v1345_v28 = vsel %vm4444_vm7, %v1343_v15, %v1344_v27  ;;  %v2084_v25 = vrot.slane %v4840_v61, 5  ;;  %v1349_v46 = vsel %vm4444_vm7, %v3205_v16, %v1348_v19  ;;  %v4865_v53 = vcombine.low %v4332_v48, %v4340_v52 }
  0x77   : > { %v1352_v32 = vsel %vm4444_vm7, %v1350_v7, %v1351_v60  ;;  %v4867_v44 = vcombine.low %v1342_v14, %v1345_v28  ;;  %v4871_v8 = vcombine.low %v4357_v13, %v4364_v24  ;;  %v1854_v43 = vshrl.u32 %v4860_v17, 16  ;;  %v3331_v60 = vld [vmem:[%s5261_s1 + $0x10] sm:$0x3]  ;;  %v4123_v14 = vld [vmem:[%s4216_s27 + $0x4] sm:$0xf] }
  0x78   : > { %v1857_v55 = vshll.u32 %v4860_v17, 16  ;;  %v1863_v12 = vshll.u32 %v4840_v61, 16  ;;  %v1867_v59 = vshrl.u32 %v4840_v61, 16  ;;  %v4877_v1 = vcombine.low %v1349_v46, %v1352_v32  ;;  %v4125_v32 = vld [vmem:[%s4216_s27] sm:$0xf] }
  0x79   : > { %v3275_v35 = vrot.slane %v4860_v17, 9  ;;  %v2086_v48 = vrot.slane %v2084_v25, 4  ;;  %v2087_v52 = vrot.slane %v274_v18, 5  ;;  %v1856_v2 = vrot.slane %v1854_v43, 4 }
  0x7a   : > { %v1859_v4 = vrot.slane %v1857_v55, 5  ;;  %v1865_v11 = vrot.slane %v1863_v12, 5  ;;  %v1869_v21 = vrot.slane %v1867_v59, 4  ;;  %v1873_v9 = vshll.u32 %v274_v18, 16 }
  0x7b   : > { %v2085_v10 = vsel %vm4444_vm7, %v3275_v35, %v2084_v25  ;;  %v2088_v51 = vsel %vm4444_vm7, %v2086_v48, %v2087_v52  ;;  %v4894_v40 = vcombine.low %v5320_v42, %v4391_v6  ;;  %v5321_v6 = vld [vmem:[#allocation15_spill] sm:$0xff]  ;;  %v1243_v28 = vrot.slane %v4123_v14, 5  ;;  %v5322_v48 = vld [vmem:[#allocation10_spill] sm:$0xff]  ;;  %v5323_v52 = vld [vmem:[#allocation12_spill] sm:$0xff] }
  0x7c   : > { %3547 = vmatmul.mubr.msk.bf16.gmra.mrb[4].mxu1 %vm716_vm3, %v4784_v23  ;;  %3699 = vmatmul.mubr.msk.bf16.gmra.mrb[20].mxu0 %vm716_vm3, %v4804_v62  ;;  %v1860_v13 = vor.u32 %v1859_v4, %v1856_v2  ;;  %v1870_v24 = vor.u32 %v1869_v21, %v1865_v11  ;;  %v1875_v58 = vrot.slane %v1873_v9, 5  ;;  %v4896_v19 = vcombine.low %v2085_v10, %v2088_v51  ;;  %v4124_v25 = vld [vmem:[%s4216_s27 + $0x8] sm:$0x1]  ;;  %v5325_v4 = vld [vmem:[#allocation17_spill] sm:$0xff]  ;;  %v5326_v21 = vld [vmem:[#allocation20_spill] sm:$0xff] }
  0x7d   : > { %3550 = vmatprep.mubr.msk.bf16.mxu1 %vm716_vm3, %v4829_v56  ;;  %3702 = vmatprep.mubr.msk.bf16.mxu0 %vm716_vm3, %v4831_v31  ;;  %v2532_v7 = vsel %vm765_vm0, %v5321_v6, 0  ;;  %v1246_v46 = vrot.slane %v4124_v25, 5  ;;  %v3190_v18 = vrot.slane %v4125_v32, 9  ;;  %v1245_v43 = vrot.slane %v1243_v28, 4  ;;  %v4126_v2 = vld [vmem:[%s5261_s1 + $0x8] sm:$0x3] }
  0x7e   : > { %v1861_v33 = vrot.slane %v1860_v13, 4  ;;  %v1871_v39 = vrot.slane %v1870_v24, 4  ;;  %v1658_v35 = vsel %vm765_vm0, %v4770_v3, 0  ;;  %v5324_v3 = vld [vmem:[#allocation14_spill] sm:$0xff]  ;;  %v4991_v24 = vld [vmem:[%s4216_s27 + $0xcc] sm:$0xf] }
  0x7f   : > { %v1244_v55 = vsel %vm4444_vm7, %v3190_v18, %v1243_v28  ;;  %v1247_v12 = vsel %vm4444_vm7, %v1245_v43, %v1246_v46  ;;  %v5327_v13 = vld [vmem:[#allocation22_spill] sm:$0xff]  ;;  %v4994_v9 = vld [vmem:[%s4216_s27 + $0xd0] sm:$0xf]  ;;  %v2744_v10 = vsel %vm765_vm0, %v3331_v60, 0  ;;  %v5333_v42 = vld [vmem:[#allocation9_spill] sm:$0xff]  ;;  %v2503_v14 = vshll.u32 %v4991_v24, 16 }
  0x80   : > { %v1866_v15 = vsel %vm4263_vm4, %v1861_v33, %v1865_v11  ;;  %v1876_v27 = vsel %vm4263_vm4, %v1871_v39, %v1875_v58  ;;  %v3207_v59 = vcombine.low %v1244_v55, %v1247_v12  ;;  %v4980_v11 = vcombine.low %v4860_v17, %v4840_v61  ;;  %v5328_v17 = vld [vmem:[#allocation3_spill] sm:$0xff]  ;;  %v5329_v51 = vld [vmem:[#allocation4_spill] sm:$0xff]  ;;  %v5330_v33 = vld [vmem:[#allocation6_spill] sm:$0xff] }
  0x81   : > { %v4902_v16 = vcombine.low %v1866_v15, %v1876_v27  ;;  %v3295_v61 = vcombine.low %v4991_v24, %v4994_v9  ;;  %v5331_v39 = vld [vmem:[#allocation7_spill] sm:$0xff]  ;;  %v5332_v58 = vld [vmem:[#allocation8_spill] sm:$0xff]  ;;  %v5335_v27 = vld [vmem:[#allocation13_spill] sm:$0xff]  ;;  %v2513_v28 = vshrl.u32 %v4994_v9, 16  ;;  %v2505_v32 = vrot.slane %v2503_v14, 5 }
  0x82   : > { %v5334_v15 = vld [vmem:[#allocation11_spill] sm:$0xff]  ;;  %v5336_v6 = vld [vmem:[#allocation16_spill] sm:$0xff]  ;;  %v5338_v25 = vld [vmem:[#allocation2_spill] sm:$0xff]  ;;  %v2730_v34 = vrot.slane %v4994_v9, 5 }
  0x83   : > { %v5339_v46 = vld [vmem:[#allocation19_spill] sm:$0xff]  ;;  %v2515_v43 = vrot.slane %v2513_v28, 4  ;;  %v277_v55 = vld [vmem:[%s4216_s27 + $0xd4] sm:$0x1]  ;;  %v5340_v12 = vld [vmem:[#allocation21_spill] sm:$0xff] }
  0x84   : > { %3551 = vmatmul.mubr.msk.bf16.gmra.mrb[8].mxu1 %vm716_vm3, %v4865_v53  ;;  %3703 = vmatmul.mubr.msk.bf16.gmra.mrb[24].mxu0 %vm716_vm3, %v4867_v44 }
  0x85   : > { %3554 = vmatprep.mubr.msk.bf16.mxu1 %vm716_vm3, %v4871_v8  ;;  %3706 = vmatprep.mubr.msk.bf16.mxu0 %vm716_vm3, %v4877_v1 }
  0x8c   : > { %3555 = vmatmul.mubr.msk.bf16.gmra.mrb[12].mxu1 %vm716_vm3, %v4894_v40  ;;  %3707 = vmatmul.mubr.msk.bf16.gmra.mrb[28].mxu0 %vm716_vm3, %v4896_v19 }
  0x8d   : > { %3558 = vmatprep.mubr.msk.bf16.mxu1 %vm716_vm3, %v4790_v22  ;;  %3712 = vmatprep.mubr.msk.bf16.mxu0 %vm716_vm3, %v4758_v47 }
  0x94   : > { %3559 = vmatmul.mubr.msk.bf16.gmra.mrb[16].mxu1 %vm716_vm3, %v4800_v57  ;;  %3713 = vmatmul.mubr.msk.bf16.vlgmr.msra.gmra.mrb[0].mxu0 %vm716_vm3, %v4784_v23 }
  0x95   : > { %3745 = vmatpush3.bf16.msra.mxu0 %v2532_v7  ;;  %3562 = vmatprep.mubr.msk.bf16.mxu1 %vm716_vm3, %v4809_v5  ;;  %v5337_v7 = vld [vmem:[#allocation18_spill] sm:$0xff] }
  0x96   : > { %3716 = vmatprep.mubr.msk.bf16.mxu0 %vm716_vm3, %v4829_v56  ;;  %4079 = vmatprep.subr.msk.bf16.mxu0 %vm765_vm0, %v3331_v60  ;;  %v2500_v60 = vshrl.u32 %v4991_v24, 16 }
  0x9c   : > { %3563 = vmatmul.mubr.msk.bf16.gmra.mrb[20].mxu1 %vm716_vm3, %v4813_v49  ;;  %3717 = vmatmul.mubr.msk.bf16.gmra.mrb[4].mxu0 %vm716_vm3, %v4865_v53 }
  0x9d   : > { %3566 = vmatprep.mubr.msk.bf16.mxu1 %vm716_vm3, %v4817_v54  ;;  %3720 = vmatprep.mubr.msk.bf16.mxu0 %vm716_vm3, %v4871_v8 }
  0xa4   : > { %3567 = vmatmul.mubr.msk.bf16.gmra.mrb[24].mxu1 %vm716_vm3, %v4821_v36  ;;  %3721 = vmatmul.mubr.msk.bf16.gmra.mrb[8].mxu0 %vm716_vm3, %v4894_v40 }
  0xa5   : > { %3570 = vmatprep.mubr.msk.bf16.mxu1 %vm716_vm3, %v4825_v45  ;;  %3724 = vmatprep.mubr.msk.bf16.mxu0 %vm716_vm3, %v4790_v22 }
  0xac   : > { %3571 = vmatmul.mubr.msk.bf16.gmra.mrb[28].mxu1 %vm716_vm3, %v4835_v29  ;;  %3725 = vmatmul.mubr.msk.bf16.gmra.mrb[12].mxu0 %vm716_vm3, %v4800_v57 }
  0xad   : > { %3576 = vmatprep.mubr.msk.bf16.mxu1 %vm716_vm3, %v3207_v59  ;;  %3728 = vmatprep.mubr.msk.bf16.mxu0 %vm716_vm3, %v4809_v5 }
  0xb4   : > { %3577 = vmatmul.mubr.msk.bf16.vlgmr.msra.gmra.mrb[0].mxu1 %vm716_vm3, %v5322_v48  ;;  %3729 = vmatmul.mubr.msk.bf16.gmra.mrb[16].mxu0 %vm716_vm3, %v4813_v49 }
  0xb5   : > { %3609 = vmatpush3.bf16.msra.mxu1 %v1658_v35  ;;  %3580 = vmatprep.mubr.msk.bf16.mxu1 %vm716_vm3, %v5323_v52  ;;  %v2519_v35 = vshll.u32 %v277_v55, 16 }
  0xb6   : > { %3732 = vmatprep.mubr.msk.bf16.mxu0 %vm716_vm3, %v4817_v54  ;;  %4075 = vmatprep.subr.msk.bf16.mxu1 %vm765_vm0, %v4126_v2 }
  0xbc   : > { %3581 = vmatmul.mubr.msk.bf16.gmra.mrb[4].mxu1 %vm716_vm3, %v5324_v3  ;;  %3733 = vmatmul.mubr.msk.bf16.gmra.mrb[20].mxu0 %vm716_vm3, %v4821_v36 }
  0xbd   : > { %3584 = vmatprep.mubr.msk.bf16.mxu1 %vm716_vm3, %v5325_v4  ;;  %3736 = vmatprep.mubr.msk.bf16.mxu0 %vm716_vm3, %v4825_v45 }
  0xc4   : > { %3585 = vmatmul.mubr.msk.bf16.gmra.mrb[8].mxu1 %vm716_vm3, %v5326_v21  ;;  %3737 = vmatmul.mubr.msk.bf16.gmra.mrb[24].mxu0 %vm716_vm3, %v4835_v29 }
  0xc5   : > { %3588 = vmatprep.mubr.msk.bf16.mxu1 %vm716_vm3, %v5327_v13  ;;  %3740 = vmatprep.mubr.msk.bf16.mxu0 %vm716_vm3, %v4980_v11 }
  0xcc   : > { %3589 = vmatmul.mubr.msk.bf16.gmra.mrb[12].mxu1 %vm716_vm3, %v4695_v37  ;;  %3741 = vmatmul.mubr.msk.bf16.gmra.mrb[28].mxu0 %vm716_vm3, %v3295_v61  ;;  %v2521_v61 = vrot.slane %v2519_v35, 5 }
  0xcd   : > { %3592 = vmatprep.mubr.msk.bf16.mxu1 %vm716_vm3, %v4726_v41  ;;  %3746 = vmatprep.mubr.msk.bf16.mxu0 %vm716_vm3, %v5328_v17 }
  0xd4   : > { %3593 = vmatmul.mubr.msk.bf16.gmra.mrb[16].mxu1 %vm716_vm3, %v4730_v50  ;;  %3747 = vmatmul.mubr.msk.bf16.vlgmr.msra.gmra.mrb[0].mxu0 %vm716_vm3, %v5329_v51 }
  0xd5   : > { %3779 = vmatpush3.bf16.msra.mxu0 %v2744_v10  ;;  %3596 = vmatprep.mubr.msk.bf16.mxu1 %vm716_vm3, %v4752_v20 }
  0xd6   : > { %3750 = vmatprep.mubr.msk.bf16.mxu0 %vm716_vm3, %v5330_v33 }
  0xdc   : > { %3597 = vmatmul.mubr.msk.bf16.gmra.mrb[20].mxu1 %vm716_vm3, %v4763_v0  ;;  %3751 = vmatmul.mubr.msk.bf16.gmra.mrb[4].mxu0 %vm716_vm3, %v5331_v39 }
  0xdd   : > { %3600 = vmatprep.mubr.msk.bf16.mxu1 %vm716_vm3, %v4804_v62  ;;  %3754 = vmatprep.mubr.msk.bf16.mxu0 %vm716_vm3, %v5332_v58 }
  0xe4   : > { %3601 = vmatmul.mubr.msk.bf16.gmra.mrb[24].mxu1 %vm716_vm3, %v4831_v31  ;;  %3755 = vmatmul.mubr.msk.bf16.gmra.mrb[8].mxu0 %vm716_vm3, %v5333_v42 }
  0xe5   : > { %3604 = vmatprep.mubr.msk.bf16.mxu1 %vm716_vm3, %v4867_v44  ;;  %3758 = vmatprep.mubr.msk.bf16.mxu0 %vm716_vm3, %v5334_v15 }
  0xec   : > { %3605 = vmatmul.mubr.msk.bf16.gmra.mrb[28].mxu1 %vm716_vm3, %v4877_v1  ;;  %3759 = vmatmul.mubr.msk.bf16.gmra.mrb[12].mxu0 %vm716_vm3, %v5335_v27 }
  0xed   : > { %3610 = vmatprep.mubr.msk.bf16.mxu1 %vm716_vm3, %v4269_v38  ;;  %3762 = vmatprep.mubr.msk.bf16.mxu0 %vm716_vm3, %v5336_v6  ;;  %v2509_v38 = vshll.u32 %v4994_v9, 16 }
  0xef   : > { %v2511_v18 = vrot.slane %v2509_v38, 5 }
  0xf1   : > { %v2516_v59 = vor.u32 %v2515_v43, %v2511_v18 }
  0xf3   : > { %v2517_v2 = vrot.slane %v2516_v59, 4 }
  0xf4   : > { %3611 = vmatmul.mubr.msk.bf16.vlgmr.msra.gmra.mrb[0].mxu1 %vm716_vm3, %v4758_v47  ;;  %3763 = vmatmul.mubr.msk.bf16.gmra.mrb[16].mxu0 %vm716_vm3, %v5337_v7  ;;  %v2502_v47 = vrot.slane %v2500_v60, 4 }
  0xf5   : > { %3813 = vmatpush3.bf16.msra.mxu1 %v5338_v25  ;;  %3614 = vmatprep.mubr.msk.bf16.mxu1 %vm716_vm3, %v4784_v23 }
  0xf6   : > { %3766 = vmatprep.mubr.msk.bf16.mxu0 %vm716_vm3, %v5339_v46  ;;  %v2506_v23 = vor.u32 %v2505_v32, %v2502_v47 }
  0xf8   : > { %v2507_v48 = vrot.slane %v2506_v23, 4 }
  0xfc   : > { %3615 = vmatmul.mubr.msk.bf16.gmra.mrb[4].mxu1 %vm716_vm3, %v4829_v56  ;;  %3767 = vmatmul.mubr.msk.bf16.gmra.mrb[20].mxu0 %vm716_vm3, %v5340_v12  ;;  %v2512_v56 = vsel %vm4263_vm4, %v2507_v48, %v2511_v18 }
  0xfd   : > { %3618 = vmatprep.mubr.msk.bf16.mxu1 %vm716_vm3, %v4865_v53  ;;  %3770 = vmatprep.mubr.msk.bf16.mxu0 %vm716_vm3, %v4697_v30  ;;  %v2522_v53 = vsel %vm4263_vm4, %v2517_v2, %v2521_v61 }
  0xfe   : > { %v3313_v17 = vcombine.low %v2512_v56, %v2522_v53 }
 0x104   : > { %3619 = vmatmul.mubr.msk.bf16.gmra.mrb[8].mxu1 %vm716_vm3, %v4871_v8  ;;  %3771 = vmatmul.mubr.msk.bf16.gmra.mrb[24].mxu0 %vm716_vm3, %v4724_v63 }
 0x105   : > { %3622 = vmatprep.mubr.msk.bf16.mxu1 %vm716_vm3, %v4894_v40  ;;  %3774 = vmatprep.mubr.msk.bf16.mxu0 %vm716_vm3, %v4902_v16 }
 0x10c   : > { %3623 = vmatmul.mubr.msk.bf16.gmra.mrb[12].mxu1 %vm716_vm3, %v4790_v22  ;;  %3775 = vmatmul.mubr.msk.bf16.gmra.mrb[28].mxu0 %vm716_vm3, %v3313_v17 }
 0x10d   : > { %3626 = vmatprep.mubr.msk.bf16.mxu1 %vm716_vm3, %v4800_v57  ;;  %3780 = vmatprep.mubr.msk.bf16.mxu0 %vm716_vm3, %v5323_v52 }
 0x114   : > { %3627 = vmatmul.mubr.msk.bf16.gmra.mrb[16].mxu1 %vm716_vm3, %v4809_v5  ;;  %3781 = vmatmul.mubr.msk.bf16.vlgmr.msra.gmra.mrb[0].mxu0 %vm716_vm3, %v5324_v3 }
 0x115   : > { %3630 = vmatprep.mubr.msk.bf16.mxu1 %vm716_vm3, %v4813_v49  ;;  %3784 = vmatprep.mubr.msk.bf16.mxu0 %vm716_vm3, %v5325_v4 }
 0x11c   : > { %3631 = vmatmul.mubr.msk.bf16.gmra.mrb[20].mxu1 %vm716_vm3, %v4817_v54  ;;  %3785 = vmatmul.mubr.msk.bf16.gmra.mrb[4].mxu0 %vm716_vm3, %v5326_v21 }
 0x11d   : > { %3634 = vmatprep.mubr.msk.bf16.mxu1 %vm716_vm3, %v4821_v36  ;;  %3788 = vmatprep.mubr.msk.bf16.mxu0 %vm716_vm3, %v5327_v13 }
 0x124   : > { %3635 = vmatmul.mubr.msk.bf16.gmra.mrb[24].mxu1 %vm716_vm3, %v4825_v45  ;;  %3789 = vmatmul.mubr.msk.bf16.gmra.mrb[8].mxu0 %vm716_vm3, %v4695_v37  ;;  %v3330_v37 = vrot.slane %v4991_v24, 9 }
 0x125   : > { %3638 = vmatprep.mubr.msk.bf16.mxu1 %vm716_vm3, %v4835_v29  ;;  %3792 = vmatprep.mubr.msk.bf16.mxu0 %vm716_vm3, %v4726_v41  ;;  %v2732_v41 = vrot.slane %v2730_v34, 4 }
 0x12c   : > { %3639 = vmatmul.mubr.msk.bf16.gmra.mrb[28].mxu1 %vm716_vm3, %v4980_v11  ;;  %3793 = vmatmul.mubr.msk.bf16.gmra.mrb[12].mxu0 %vm716_vm3, %v4730_v50  ;;  %v2733_v50 = vrot.slane %v277_v55, 5 }
 0x12d   : > { %3660 = vmatprep.mubr.msk.bf16.mxu1 %vm716_vm3, %v5335_v27  ;;  %3796 = vmatprep.mubr.msk.bf16.mxu0 %vm716_vm3, %v4752_v20  ;;  %v2731_v20 = vsel %vm4444_vm7, %v3330_v37, %v2730_v34 }
 0x134   : > { %3661 = vmatmul.mubr.msk.bf16.vlgmr.msra.gmra.mrb[16].mxu1 %vm716_vm3, %v5336_v6  ;;  %3797 = vmatmul.mubr.msk.bf16.gmra.mrb[16].mxu0 %vm716_vm3, %v4763_v0  ;;  %v2734_v0 = vsel %vm4444_vm7, %v2732_v41, %v2733_v50 }
 0x135   : > { %3664 = vmatprep.mubr.msk.bf16.mxu1 %vm716_vm3, %v5337_v7  ;;  %3800 = vmatprep.mubr.msk.bf16.mxu0 %vm716_vm3, %v4804_v62  ;;  %v3332_v22 = vcombine.low %v2731_v20, %v2734_v0 }
 0x13c   : > { %3665 = vmatmul.mubr.msk.bf16.gmra.mrb[20].mxu1 %vm716_vm3, %v5339_v46  ;;  %3801 = vmatmul.mubr.msk.bf16.gmra.mrb[20].mxu0 %vm716_vm3, %v4831_v31 }
 0x13d   : > { %3668 = vmatprep.mubr.msk.bf16.mxu1 %vm716_vm3, %v5340_v12  ;;  %3804 = vmatprep.mubr.msk.bf16.mxu0 %vm716_vm3, %v4867_v44 }
 0x144   : > { %3669 = vmatmul.mubr.msk.bf16.gmra.mrb[24].mxu1 %vm716_vm3, %v4697_v30  ;;  %3805 = vmatmul.mubr.msk.bf16.gmra.mrb[24].mxu0 %vm716_vm3, %v4877_v1 }
 0x145   : > { %3672 = vmatprep.mubr.msk.bf16.mxu1 %vm716_vm3, %v4724_v63  ;;  %3808 = vmatprep.mubr.msk.bf16.mxu0 %vm716_vm3, %v4896_v19  ;;  %v5148_v19 = vld [vmem:[%s5262_s2] ss:$0 sm:$0xff] }
 0x14c   : > { %3673 = vmatmul.mubr.msk.bf16.gmra.mrb[28].mxu1 %vm716_vm3, %v4902_v16  ;;  %3809 = vmatmul.mubr.msk.bf16.gmra.mrb[28].mxu0 %vm716_vm3, %v3332_v22 }
 0x1c7   : > { %v3612_v30 = vpop.f32.mrb[0].mxu1 }
 0x1c8   : > { %v1694_v57 = vpop.f32.mrb[1].mxu1 }
 0x1c9   : > { %v3613_v62 = vpop.f32.mrb[2].mxu1 }
 0x1ca   : > { %v1697_v63 = vpop.f32.mrb[3].mxu1 }
 0x1cf   : > { %v3616_v5 = vpop.f32.mrb[4].mxu1 }
 0x1d0   : > { %v1710_v49 = vpop.f32.mrb[5].mxu1 }
 0x1d1   : > { %v3617_v54 = vpop.f32.mrb[6].mxu1 }
 0x1d2   : > { %v1713_v36 = vpop.f32.mrb[7].mxu1 }
 0x1d7   : > { %v3620_v45 = vpop.f32.mrb[8].mxu1 }
 0x1d8   : > { %v1726_v31 = vpop.f32.mrb[9].mxu1 }
 0x1d9   : > { %v3621_v29 = vpop.f32.mrb[10].mxu1 }
 0x1da   : > { %v1729_v26 = vpop.f32.mrb[11].mxu1 }
 0x1df   : > { %v3624_v44 = vpop.f32.mrb[12].mxu1 }
 0x1e0   : > { %v1742_v8 = vpop.f32.mrb[13].mxu1 }
 0x1e1   : > { %v3625_v1 = vpop.f32.mrb[14].mxu1 }
 0x1e2   : > { %v1745_v40 = vpop.f32.mrb[15].mxu1 }
 0x1e7   : > { %v3782_v16 = vpop.f32.mrb[0].mxu0 }
 0x1e8   : > { %v3814_v52 = vadd.f32 %v3782_v16, %v3612_v30  ;;  %v2780_v3 = vpop.f32.mrb[1].mxu0 }
 0x1e9   : > { %v3815_v4 = vadd.f32 %v2780_v3, %v1694_v57  ;;  %v3783_v11 = vpop.f32.mrb[2].mxu0 }
 0x1ea   : > { %v2947_v21 = vadd.f32 %v3814_v52, %v5148_v19  ;;  %v3816_v13 = vadd.f32 %v3783_v11, %v3613_v62  ;;  %v2783_v24 = vpop.f32.mrb[3].mxu0 }
 0x1eb   : > { %v2945_v9 = vadd.f32 %v3815_v4, %v5148_v19  ;;  %v3817_v10 = vadd.f32 %v2783_v24, %v1697_v63 }
 0x1ec   : > { %2980 = vst.msk [vmem:[%s5153_s22 + $0x10] sm:$0xff] %vm2977_vm8, %v2947_v21  ;;  %v2948_v51 = vadd.f32 %v3816_v13, %v5148_v19 }
 0x1ed   : > { %2978 = vst.msk [vmem:[%s5153_s22] sm:$0xff] %vm2977_vm8, %v2945_v9  ;;  %v2946_v33 = vadd.f32 %v3817_v10, %v5148_v19 }
 0x1ee   : > { %2981 = vst.msk [vmem:[%s5153_s22 + $0x18] sm:$0xff] %vm2977_vm8, %v2948_v51 }
 0x1ef   : > { %2979 = vst.msk [vmem:[%s5153_s22 + $0x8] sm:$0xff] %vm2977_vm8, %v2946_v33  ;;  %v3786_v39 = vpop.f32.mrb[4].mxu0 }
 0x1f0   : > { %v3818_v58 = vadd.f32 %v3786_v39, %v3616_v5  ;;  %v2796_v42 = vpop.f32.mrb[5].mxu0 }
 0x1f1   : > { %v3819_v15 = vadd.f32 %v2796_v42, %v1710_v49  ;;  %v3787_v27 = vpop.f32.mrb[6].mxu0 }
 0x1f2   : > { %v2951_v6 = vadd.f32 %v3818_v58, %v5148_v19  ;;  %v3820_v7 = vadd.f32 %v3787_v27, %v3617_v54  ;;  %v2799_v60 = vpop.f32.mrb[7].mxu0 }
 0x1f3   : > { %v2949_v14 = vadd.f32 %v3819_v15, %v5148_v19  ;;  %v3821_v28 = vadd.f32 %v2799_v60, %v1713_v36 }
 0x1f4   : > { %2984 = vst.msk [vmem:[%s5153_s22 + $0x30] sm:$0xff] %vm2977_vm8, %v2951_v6  ;;  %v2952_v25 = vadd.f32 %v3820_v7, %v5148_v19 }
 0x1f5   : > { %2982 = vst.msk [vmem:[%s5153_s22 + $0x20] sm:$0xff] %vm2977_vm8, %v2949_v14  ;;  %v2950_v38 = vadd.f32 %v3821_v28, %v5148_v19 }
 0x1f6   : > { %2985 = vst.msk [vmem:[%s5153_s22 + $0x38] sm:$0xff] %vm2977_vm8, %v2952_v25 }
 0x1f7   : > { %2983 = vst.msk [vmem:[%s5153_s22 + $0x28] sm:$0xff] %vm2977_vm8, %v2950_v38  ;;  %v3790_v46 = vpop.f32.mrb[8].mxu0 }
 0x1f8   : > { %v3822_v47 = vadd.f32 %v3790_v46, %v3620_v45  ;;  %v2812_v32 = vpop.f32.mrb[9].mxu0 }
 0x1f9   : > { %v3823_v18 = vadd.f32 %v2812_v32, %v1726_v31  ;;  %v3791_v43 = vpop.f32.mrb[10].mxu0 }
 0x1fa   : > { %v2955_v55 = vadd.f32 %v3822_v47, %v5148_v19  ;;  %v3824_v12 = vadd.f32 %v3791_v43, %v3621_v29  ;;  %v2815_v23 = vpop.f32.mrb[11].mxu0 }
 0x1fb   : > { %v2953_v59 = vadd.f32 %v3823_v18, %v5148_v19  ;;  %v3825_v35 = vadd.f32 %v2815_v23, %v1729_v26 }
 0x1fc   : > { %2988 = vst.msk [vmem:[%s5153_s22 + $0x50] sm:$0xff] %vm2977_vm8, %v2955_v55  ;;  %v2956_v48 = vadd.f32 %v3824_v12, %v5148_v19 }
 0x1fd   : > { %2986 = vst.msk [vmem:[%s5153_s22 + $0x40] sm:$0xff] %vm2977_vm8, %v2953_v59  ;;  %v2954_v2 = vadd.f32 %v3825_v35, %v5148_v19 }
 0x1fe   : > { %2989 = vst.msk [vmem:[%s5153_s22 + $0x58] sm:$0xff] %vm2977_vm8, %v2956_v48 }
 0x1ff   : > { %2987 = vst.msk [vmem:[%s5153_s22 + $0x48] sm:$0xff] %vm2977_vm8, %v2954_v2  ;;  %v3794_v61 = vpop.f32.mrb[12].mxu0 }
 0x200   : > { %v3826_v56 = vadd.f32 %v3794_v61, %v3624_v44  ;;  %v2828_v53 = vpop.f32.mrb[13].mxu0 }
 0x201   : > { %v3827_v17 = vadd.f32 %v2828_v53, %v1742_v8  ;;  %v3795_v34 = vpop.f32.mrb[14].mxu0 }
 0x202   : > { %v2959_v37 = vadd.f32 %v3826_v56, %v5148_v19  ;;  %v3828_v41 = vadd.f32 %v3795_v34, %v3625_v1  ;;  %v2831_v50 = vpop.f32.mrb[15].mxu0 }
 0x203   : > { %v2957_v20 = vadd.f32 %v3827_v17, %v5148_v19  ;;  %v3829_v0 = vadd.f32 %v2831_v50, %v1745_v40 }
 0x204   : > { %2992 = vst.msk [vmem:[%s5153_s22 + $0x70] sm:$0xff] %vm2977_vm8, %v2959_v37  ;;  %v2960_v22 = vadd.f32 %v3828_v41, %v5148_v19 }
 0x205   : > { %2990 = vst.msk [vmem:[%s5153_s22 + $0x60] sm:$0xff] %vm2977_vm8, %v2957_v20  ;;  %v2958_v30 = vadd.f32 %v3829_v0, %v5148_v19 }
 0x206   : > { %2993 = vst.msk [vmem:[%s5153_s22 + $0x78] sm:$0xff] %vm2977_vm8, %v2960_v22 }
 0x207   : > { %2991 = vst.msk [vmem:[%s5153_s22 + $0x68] sm:$0xff] %vm2977_vm8, %v2958_v30  ;;  %v3662_v57 = vpop.f32.mrb[16].mxu1  ;;  %v3798_v62 = vpop.f32.mrb[16].mxu0 }
 0x208   : > { %v3830_v63 = vadd.f32 %v3798_v62, %v3662_v57  ;;  %v1986_v5 = vpop.f32.mrb[17].mxu1  ;;  %v2844_v49 = vpop.f32.mrb[17].mxu0 }
 0x209   : > { %v3831_v54 = vadd.f32 %v2844_v49, %v1986_v5  ;;  %v3663_v36 = vpop.f32.mrb[18].mxu1  ;;  %v3799_v45 = vpop.f32.mrb[18].mxu0 }
 0x20a   : > { %v2963_v31 = vadd.f32 %v3830_v63, %v5148_v19  ;;  %v3832_v29 = vadd.f32 %v3799_v45, %v3663_v36  ;;  %v1989_v26 = vpop.f32.mrb[19].mxu1  ;;  %v2847_v44 = vpop.f32.mrb[19].mxu0 }
 0x20b   : > { %v2961_v8 = vadd.f32 %v3831_v54, %v5148_v19  ;;  %v3833_v1 = vadd.f32 %v2847_v44, %v1989_v26 }
 0x20c   : > { %2996 = vst.msk [vmem:[%s5153_s22 + $0x90] sm:$0xff] %vm2977_vm8, %v2963_v31  ;;  %v2964_v40 = vadd.f32 %v3832_v29, %v5148_v19 }
 0x20d   : > { %2994 = vst.msk [vmem:[%s5153_s22 + $0x80] sm:$0xff] %vm2977_vm8, %v2961_v8  ;;  %v2962_v16 = vadd.f32 %v3833_v1, %v5148_v19 }
 0x20e   : > { %2997 = vst.msk [vmem:[%s5153_s22 + $0x98] sm:$0xff] %vm2977_vm8, %v2964_v40 }
 0x20f   : > { %2995 = vst.msk [vmem:[%s5153_s22 + $0x88] sm:$0xff] %vm2977_vm8, %v2962_v16  ;;  %v3666_v52 = vpop.f32.mrb[20].mxu1  ;;  %v3802_v3 = vpop.f32.mrb[20].mxu0 }
 0x210   : > { %v3834_v4 = vadd.f32 %v3802_v3, %v3666_v52  ;;  %v2002_v11 = vpop.f32.mrb[21].mxu1  ;;  %v2860_v21 = vpop.f32.mrb[21].mxu0 }
 0x211   : > { %v3835_v13 = vadd.f32 %v2860_v21, %v2002_v11  ;;  %v3667_v24 = vpop.f32.mrb[22].mxu1  ;;  %v3803_v9 = vpop.f32.mrb[22].mxu0 }
 0x212   : > { %v2967_v10 = vadd.f32 %v3834_v4, %v5148_v19  ;;  %v3836_v51 = vadd.f32 %v3803_v9, %v3667_v24  ;;  %v2005_v33 = vpop.f32.mrb[23].mxu1  ;;  %v2863_v39 = vpop.f32.mrb[23].mxu0 }
 0x213   : > { %v2965_v58 = vadd.f32 %v3835_v13, %v5148_v19  ;;  %v3837_v42 = vadd.f32 %v2863_v39, %v2005_v33 }
 0x214   : > { %3000 = vst.msk [vmem:[%s5153_s22 + $0xb0] sm:$0xff] %vm2977_vm8, %v2967_v10  ;;  %v2968_v15 = vadd.f32 %v3836_v51, %v5148_v19 }
 0x215   : > { %2998 = vst.msk [vmem:[%s5153_s22 + $0xa0] sm:$0xff] %vm2977_vm8, %v2965_v58  ;;  %v2966_v27 = vadd.f32 %v3837_v42, %v5148_v19 }
 0x216   : > { %3001 = vst.msk [vmem:[%s5153_s22 + $0xb8] sm:$0xff] %vm2977_vm8, %v2968_v15 }
 0x217   : > { %2999 = vst.msk [vmem:[%s5153_s22 + $0xa8] sm:$0xff] %vm2977_vm8, %v2966_v27  ;;  %v3670_v6 = vpop.f32.mrb[24].mxu1  ;;  %v3806_v7 = vpop.f32.mrb[24].mxu0 }
 0x218   : > { %v3838_v60 = vadd.f32 %v3806_v7, %v3670_v6  ;;  %v2018_v14 = vpop.f32.mrb[25].mxu1  ;;  %v2876_v28 = vpop.f32.mrb[25].mxu0 }
 0x219   : > { %v3839_v25 = vadd.f32 %v2876_v28, %v2018_v14  ;;  %v3671_v38 = vpop.f32.mrb[26].mxu1  ;;  %v3807_v46 = vpop.f32.mrb[26].mxu0 }
 0x21a   : > { %v2971_v47 = vadd.f32 %v3838_v60, %v5148_v19  ;;  %v3840_v32 = vadd.f32 %v3807_v46, %v3671_v38  ;;  %v2021_v18 = vpop.f32.mrb[27].mxu1  ;;  %v2879_v43 = vpop.f32.mrb[27].mxu0 }
 0x21b   : > { %v2969_v55 = vadd.f32 %v3839_v25, %v5148_v19  ;;  %v3841_v12 = vadd.f32 %v2879_v43, %v2021_v18 }
 0x21c   : > { %3004 = vst.msk [vmem:[%s5153_s22 + $0xd0] sm:$0xff] %vm2977_vm8, %v2971_v47  ;;  %v2972_v23 = vadd.f32 %v3840_v32, %v5148_v19 }
 0x21d   : > { %3002 = vst.msk [vmem:[%s5153_s22 + $0xc0] sm:$0xff] %vm2977_vm8, %v2969_v55  ;;  %v2970_v59 = vadd.f32 %v3841_v12, %v5148_v19 }
 0x21e   : > { %3005 = vst.msk [vmem:[%s5153_s22 + $0xd8] sm:$0xff] %vm2977_vm8, %v2972_v23 }
 0x21f   : > { %3003 = vst.msk [vmem:[%s5153_s22 + $0xc8] sm:$0xff] %vm2977_vm8, %v2970_v59  ;;  %v3674_v35 = vpop.f32.mrb[28].mxu1  ;;  %v3810_v48 = vpop.f32.mrb[28].mxu0 }
 0x220   : > { %v3842_v2 = vadd.f32 %v3810_v48, %v3674_v35  ;;  %v2034_v61 = vpop.f32.mrb[29].mxu1  ;;  %v2892_v56 = vpop.f32.mrb[29].mxu0 }
 0x221   : > { %v3843_v53 = vadd.f32 %v2892_v56, %v2034_v61  ;;  %v3675_v17 = vpop.f32.mrb[30].mxu1  ;;  %v3811_v34 = vpop.f32.mrb[30].mxu0 }
 0x222   : > { %v2975_v37 = vadd.f32 %v3842_v2, %v5148_v19  ;;  %v3844_v41 = vadd.f32 %v3811_v34, %v3675_v17  ;;  %v2037_v50 = vpop.f32.mrb[31].mxu1  ;;  %v2895_v20 = vpop.f32.mrb[31].mxu0 }
 0x223   : > { %v2973_v0 = vadd.f32 %v3843_v53, %v5148_v19  ;;  %v3845_v22 = vadd.f32 %v2895_v20, %v2037_v50 }
 0x224   : > { %3008 = vst.msk [vmem:[%s5153_s22 + $0xf0] sm:$0xff] %vm2977_vm8, %v2975_v37  ;;  %v2976_v30 = vadd.f32 %v3844_v41, %v5148_v19 }
 0x225   : > { %3006 = vst.msk [vmem:[%s5153_s22 + $0xe0] sm:$0xff] %vm2977_vm8, %v2973_v0  ;;  %v2974_v57 = vadd.f32 %v3845_v22, %v5148_v19 }
 0x226   : > { %3009 = vst.msk [vmem:[%s5153_s22 + $0xf8] sm:$0xff] %vm2977_vm8, %v2976_v30 }
 0x227   : > { %3007 = vst.msk [vmem:[%s5153_s22 + $0xe8] sm:$0xff] %vm2977_vm8, %v2974_v57 }
 0x228 PF: > { %s13_s14 = sadd.s32 1, %s4149_s14   ;;  %s5341_s12 = smov %s4145_s13 }
 0x229   : > { %p10_p5 = scmp.ge.s32.totalorder %s13_s14, 4   ;;  %s5342_s13 = smov %s5344_s15 }
 0x22b   :  { %12 = sbr.rel (!%p10_p5) target bundleno = 2 (0x2), region = 76 }

</bundles_post_ra>
